<compile_context>
chip_gen: v7x
topology: tpu7x:2x2x1
jax: 0.10.0
libtpu: 0.0.40
codegen_flags: <defaults>
</compile_context>

<pallas_src>
import jax
import jax.numpy as jnp
from jax.experimental import pallas as pl
from jax.experimental.pallas import tpu as pltpu


def _linear_bias_kernel(x_ref, w_ref, b_ref, o_ref):
    """One (tm, E) output tile of  X @ W + b  with the full K contracted in one dot.

    x_ref : (tm, K)  input tile (streamed over the 1-D M grid)
    w_ref : (K,  E)  full weight panel (constant index map -> resident in VMEM)
    b_ref : (1,  E)  bias (resident)
    o_ref : (tm, E)  output tile
    """
    acc = jnp.dot(x_ref[...], w_ref[...], preferred_element_type=jnp.float32)
    o_ref[...] = (acc + b_ref[...].astype(jnp.float32)).astype(o_ref.dtype)


def _candidate_tms(M):
    """Divisors of M that are multiples of 8 (sublane-aligned)."""
    cands = [t for t in range(8, M + 1, 8) if M % t == 0]
    return cands if cands else [M]


def _pick_tm(M, preferred, vmem_ok):
    """Pick the M tile: VMEM-feasible, <= preferred, prefer >=2 grid blocks
    (v7x megacore), then MXU alignment (256, then 128), then size."""
    cands = sorted(_candidate_tms(M), reverse=True)
    feas = [t for t in cands if vmem_ok(t)] or [cands[-1]]
    small = [t for t in feas if t <= preferred] or [min(feas)]

    def score(t):
        return ((M // t) >= 2, t % 256 == 0, t % 128 == 0, t)

    return max(small, key=score)


def image_encoder_forward(cnn_features, fc_weight, fc_bias, *, preferred_tm=512):
    """Pallas forward of ImageEncoder's head.

    cnn_features : (B, 131072) — output of the frozen inception_v3 backbone
                   (avgpool / dropout / fc replaced by Identity).  May already be
                   bf16 if the backbone emits bf16 (no wrapper-side cast is done).
    fc_weight    : (E, 2048)   — nn.Linear weight, PyTorch layout.
    fc_bias      : (E,)        — nn.Linear bias.
    returns      : (B, 64, E)  — Dropout(0.1)(fc(features.reshape(-1, 64, 2048))).
                   Dropout(p=0.1) is identity in eval mode.
    """
    B = cnn_features.shape[0]
    E, K = fc_weight.shape
    assert K == 2048, "ImageEncoder.fc is Linear(2048, embedding_dim)"
    assert cnn_features.shape[1] == 64 * K
    assert E % 128 == 0, (
        "embedding_dim must be a multiple of 128 for a lane-dense resident weight "
        "panel; pad the Linear output dimension."
    )

    out_dtype = cnn_features.dtype

    # `out.reshape(-1, 64, 2048)` from the module, flattened to a 2-D matmul problem.
    x2d = cnn_features.reshape(B * 64, K)                # (M, K), dtype as produced
    w = fc_weight.T.astype(x2d.dtype)                    # (K, E) — cheap one-time cast
    b = fc_bias.reshape(1, E)

    M = x2d.shape[0]
    x_item = jnp.dtype(x2d.dtype).itemsize
    w_item = jnp.dtype(w.dtype).itemsize
    o_item = jnp.dtype(out_dtype).itemsize

    # Generation-aware VMEM budget: 44 MiB is safe on v7x (64 MiB/TC) and leaves room
    # for compiler-internal scratch; v5e/v6e (128 MiB) trivially fit.
    budget = 44 * 1024 * 1024
    w_resident = 2 * K * E * w_item + 2 * 8 * E * 4      # double-buffered W + padded bias
    assert w_resident < budget, (
        "Weight panel does not fit the VMEM budget; use bf16 weights or tile the "
        "embedding dimension."
    )

    def vmem_need(tm):
        # double-buffered X tile + resident W + bias + double-buffered output tile
        return 2 * tm * K * x_item + w_resident + 2 * tm * E * o_item

    tm = _pick_tm(M, preferred_tm, lambda t: vmem_need(t) <= budget)
    grid = (M // tm,)

    vmem_limit = min(vmem_need(tm) + (8 * 1024 * 1024), budget)

    # Single-pass traffic: X read once, W read once, bias once, output written once.
    flops = 2 * M * K * E
    bytes_accessed = int(M * K * x_item + K * E * w_item + E * 4 + M * E * o_item)

    out2d = pl.pallas_call(
        _linear_bias_kernel,
        out_shape=jax.ShapeDtypeStruct((M, E), out_dtype),
        grid_spec=pltpu.PrefetchScalarGridSpec(
            num_scalar_prefetch=0,
            grid=grid,
            in_specs=[
                pl.BlockSpec((tm, K), lambda i: (i, 0)),   # X: streamed over M
                pl.BlockSpec((K, E), lambda i: (0, 0)),    # W: constant -> resident
                pl.BlockSpec((1, E), lambda i: (0, 0)),    # bias: resident
            ],
            out_specs=pl.BlockSpec((tm, E), lambda i: (i, 0)),
        ),
        compiler_params=pltpu.CompilerParams(
            dimension_semantics=("parallel",),
            vmem_limit_bytes=vmem_limit,
        ),
        cost_estimate=pl.CostEstimate(
            flops=flops, transcendentals=0, bytes_accessed=bytes_accessed
        ),
    )(x2d, w, b)

    out = out2d.reshape(B, 64, E)
    # Dropout(p=0.1) in eval mode is identity.
    # TODO(synk): training-mode dropout would need pltpu.prng_seed +
    #             pltpu.stateful_bernoulli masking inside the kernel.
    return out


def image_encoder_reference(cnn_features, fc_weight, fc_bias):
    """Pure-JAX reference with identical semantics."""
    B = cnn_features.shape[0]
    E, K = fc_weight.shape
    x = cnn_features.reshape(B, 64, K)
    w = fc_weight.T.astype(x.dtype)
    y = jnp.dot(x, w, preferred_element_type=jnp.float32) + fc_bias.astype(jnp.float32)
    return y.astype(cnn_features.dtype)


if __name__ == "__main__":
    # Small but module-consistent shapes:
    #   B=2 images, 64 spatial tokens (8x8), 2048 inception feature channels,
    #   embedding_dim E=256 (lane-dense: multiple of 128).
    B, S, K, E = 2, 64, 2048, 256

    root = jax.random.PRNGKey(0)
    kf, kw, kb = jax.random.split(root, 3)

    # Stand-in for the frozen inception_v3 backbone output: self.cnn(x) returns the
    # flattened (2048, 8, 8) feature map -> (B, 131072).
    cnn_features = jax.random.normal(kf, (B, S * K), dtype=jnp.float32)

    # nn.Linear(2048, E) params, PyTorch default init U(-1/sqrt(K), 1/sqrt(K)).
    lim = 1.0 / jnp.sqrt(jnp.float32(K))
    fc_weight = jax.random.uniform(kw, (E, K), jnp.float32, -lim, lim)
    fc_bias = jax.random.uniform(kb, (E,), jnp.float32, -lim, lim)

    # f32 path.
    out = jax.block_until_ready(image_encoder_forward(cnn_features, fc_weight, fc_bias))
    ref = jax.block_until_ready(image_encoder_reference(cnn_features, fc_weight, fc_bias))
    assert out.shape == (B, S, E), out.shape
    assert jnp.allclose(out, ref, atol=2e-4, rtol=2e-4), float(jnp.max(jnp.abs(out - ref)))

    # bf16-producer path: the backbone emits bf16 features, so the kernel reads half the
    # HBM bytes for X with no wrapper-side cast pass; f32 accumulation in-kernel.
    feats_bf16 = cnn_features.astype(jnp.bfloat16)  # stand-in for a bf16-emitting backbone
    out_bf = jax.block_until_ready(image_encoder_forward(feats_bf16, fc_weight, fc_bias))
    ref_bf = jax.block_until_ready(image_encoder_reference(feats_bf16, fc_weight, fc_bias))
    assert out_bf.shape == (B, S, E), out_bf.shape
    assert jnp.allclose(
        out_bf.astype(jnp.float32), ref_bf.astype(jnp.float32), atol=2e-2, rtol=2e-2
    ), float(jnp.max(jnp.abs(out_bf.astype(jnp.float32) - ref_bf.astype(jnp.float32))))

    print("KERNEL_OK")
</pallas_src>

<mosaic_0001>
module attributes {stable_mosaic.version = 11 : i64} {
  func.func @_linear_bias_kernel(%arg0: i32, %arg1: memref<64x2048xf32, #tpu.memory_space<vmem>>, %arg2: memref<2048x256xf32, #tpu.memory_space<vmem>>, %arg3: memref<1x256xf32, #tpu.memory_space<vmem>>, %arg4: memref<64x256xf32, #tpu.memory_space<vmem>>) attributes {dimension_semantics = [#tpu.dimension_semantics<parallel>], iteration_bounds = array<i64: 2>, scalar_prefetch = 0 : i64, scratch_operands = 0 : i64, tpu.core_type = #tpu.core_type<tc>, window_params = [{transform_indices = @transform_0, window_bounds = array<i64: 64, 2048>}, {pipeline_mode = #tpu.pipeline_mode<synchronous>, transform_indices = @transform_1, window_bounds = array<i64: 2048, 256>}, {pipeline_mode = #tpu.pipeline_mode<synchronous>, transform_indices = @transform_2, window_bounds = array<i64: 1, 256>}, {transform_indices = @transform_3, window_bounds = array<i64: 64, 256>}]} {
    %c0 = arith.constant 0 : index
    %c0_0 = arith.constant 0 : index
    %0 = vector.load %arg1[%c0, %c0_0] : memref<64x2048xf32, #tpu.memory_space<vmem>>, vector<64x2048xf32>
    %c0_1 = arith.constant 0 : index
    %c0_2 = arith.constant 0 : index
    %1 = vector.load %arg2[%c0_1, %c0_2] : memref<2048x256xf32, #tpu.memory_space<vmem>>, vector<2048x256xf32>
    %cst = arith.constant dense<0.000000e+00> : vector<64x256xf32>
    %2 = tpu.matmul %0, %1, %cst {dimension_numbers = #tpu.dot_dimension_numbers<[1], [0], [0], [1], [0, 0, 1, 1], [], []>} : vector<64x2048xf32>, vector<2048x256xf32>, vector<64x256xf32> -> vector<64x256xf32>
    %c0_3 = arith.constant 0 : index
    %c0_4 = arith.constant 0 : index
    %3 = vector.load %arg3[%c0_3, %c0_4] : memref<1x256xf32, #tpu.memory_space<vmem>>, vector<1x256xf32>
    %4 = vector.broadcast %3 : vector<1x256xf32> to vector<64x256xf32>
    %5 = arith.addf %2, %4 : vector<64x256xf32>
    %c0_5 = arith.constant 0 : index
    %c0_6 = arith.constant 0 : index
    %6 = vector.load %arg4[%c0_5, %c0_6] : memref<64x256xf32, #tpu.memory_space<vmem>>, vector<64x256xf32>
    tpu.vector_store %arg4[%c0_5, %c0_6], %5 {strides = array<i32>} : memref<64x256xf32, #tpu.memory_space<vmem>>, vector<64x256xf32>,
    return
  }
  func.func @transform_0(%arg0: i32) -> (i32, i32) {
    %c0_i32 = arith.constant 0 : i32
    %c0_i32_0 = arith.constant 0 : i32
    return %arg0, %c0_i32 : i32, i32
  }
  func.func @transform_1(%arg0: i32) -> (i32, i32) {
    %c0_i32 = arith.constant 0 : i32
    %c0_i32_0 = arith.constant 0 : i32
    %c0_i32_1 = arith.constant 0 : i32
    return %c0_i32, %c0_i32_0 : i32, i32
  }
  func.func @transform_2(%arg0: i32) -> (i32, i32) {
    %c0_i32 = arith.constant 0 : i32
    %c0_i32_0 = arith.constant 0 : i32
    %c0_i32_1 = arith.constant 0 : i32
    return %c0_i32, %c0_i32_0 : i32, i32
  }
  func.func @transform_3(%arg0: i32) -> (i32, i32) {
    %c0_i32 = arith.constant 0 : i32
    %c0_i32_0 = arith.constant 0 : i32
    return %arg0, %c0_i32 : i32, i32
  }
}

</mosaic_0001>

<bundles_post_ra>
// kernel: tpu_custom_call.1
= control target key start
LH: loop header
LB: loop body
LE: loop exit
PB: predicated region body
PF: predicated region fallthrough
CT: control target
= control target key end

     0   :  { %8 = vsyncpa [#allocation3], 0  ;;  %s3227_s0 = inlined_call_operand.hbm [shape: f32[128,2048], index: 0, kind: input, shape index: {}]   ;;  %s3228_s1 = inlined_call_operand.hbm [shape: f32[2048,256], index: 1, kind: input, shape index: {}]   ;;  %s3229_s2 = inlined_call_operand.hbm [shape: f32[1,256], index: 2, kind: input, shape index: {}]   ;;  %s3230_s3 = inlined_call_operand.hbm [shape: f32[128,256], index: 3, kind: output, shape index: {}]  }
   0x1   :  { %10 = vsyncpa [#allocation3 + $0x1], 0 }
   0x2   :  { %11 = vsyncpa [#allocation6], 0 }
   0x3   :  { %12 = vsyncpa [#allocation4], 0 }
   0x4   :  { %14 = vsyncpa [#allocation4 + $0x1], 0  ;;  %s2823_s12 = smov 0   ;;  %s2825_s13 = smov 0  }
   0x5   :  { %s2827_s14 = smov 0   ;;  %s2829_s15 = smov 0  }
   0x6 LB: > { %s2844_s16 = sadd.s32 4294967295, %s2791_s15   ;;  %s1898_s17 = sadd.s32 4294967294, %s2791_s15   ;;  %s2791_s15 = sphi %s2829_s15, %s3250_s15   ;;  %s2787_s14 = sphi %s2827_s14, %s3249_s14   ;;  %s2783_s13 = sphi %s2825_s13, %s3248_s13   ;;  %s2779_s12 = sphi %s2823_s12, %s3247_s12  }
   0x7   : > { %p40_p0 = scmp.ne.s32.totalorder %s2783_s13, %s2779_s12  ;;  %p3231_p1 = scmp.eq.s32.totalorder %s2844_s16, 0 }
   0x8   : > { %p112_p3 = scmp.eq.s32.totalorder %s1898_s17, 1  ;;  %p1899_p5 = scmp.ge.s32.totalorder %s2791_s15, 1 }
   0x9   : > { %p2853_p4 = por %p3231_p1, %p40_p0  ;;  %p119_p7 = scmp.lt.s32.totalorder %s2791_s15, 3 }
   0xa   : > { %p2858_p6 = por %p112_p3, %p40_p0  ;;  %s2793_s21 = smov [#allocation5]  }
   0xb   : > { %s3234_s18 = scalar_select %p2853_p4, 1, 0 }
   0xc   : > { %s3235_s19 = scalar_select %p2858_p6, 1, 0 }
   0xd   : > { %p2863_p8 = pnand %p1899_p5, %p119_p7  ;;  %s131_s22 = sshll.u32 %s2793_s21, 4  ;;  %s2867_s22 = int_to_ptr.vmem [resolvable:$true] %s131_s22 }
   0xe   : > { %s2794_s24 = smov [#allocation7]   ;;  %s2635_s28 = scalar_lea.hbm %s3228_s1, 65536 }
   0xf   : > { %p2574_p9 = pneg %p2863_p8  ;;  %s145_s25 = sshll.u32 %s2794_s24, 4  ;;  %s2878_s25 = int_to_ptr.vmem [resolvable:$true] %s145_s25 }
  0x10   : > { %p2636_p12 = scmp.ne.s32.totalorder %s3228_s1, %s2635_s28  ;;  %p2642_p5 = scmp.lt.u32.totalorder %s2635_s28, %s3228_s1 }
  0x11   : > { %p2874_p11 = pnand %p2574_p9, %p3231_p1 }
  0x13   : > { %p2637_p13 = pneg %p2874_p11 }
  0x15   : > { %p2638_p0 = pnand %p2637_p13, %p2636_p12 }
  0x17   : > { %p2639_p3 = pneg %p2638_p0 }
  0x19   : > { %p2644_p7 = pnand %p2642_p5, %p2639_p3 }
  0x1b   : > { %2647 = shalt.err (!%p2644_p7)
}
  0x1c   : > { %s2648_s6 = scalar_lea.vmem %s2867_s22, 65536  ;;  %p2656_p2 = scmp.lt.s32.totalorder %s2867_s22, %s2867_s22 }
  0x1d   : > { %p2649_p9 = scmp.ne.s32.totalorder %s2867_s22, %s2648_s6  ;;  %p2657_p12 = scmp.lt.s32.totalorder %s2648_s6, %s2648_s6 }
  0x1f   : > { %p2651_p10 = pnand %p2649_p9, %p2637_p13  ;;  %p2658_p0 = por %p2657_p12, %p2656_p2 }
  0x21   : > { %p2652_p1 = pneg %p2651_p10 }
  0x23   : > { %p2659_p6 = pnand %p2658_p0, %p2652_p1 }
  0x25   : > { %2662 = shalt.err (!%p2659_p6)
}
  0x26   : > { %s2795_s7 = smov 256   ;;  %s2796_s8 = smov 16  }
  0x27   : > { %2577 = dma.hbm_to_vmem [thread:$0]  (!%p2874_p11), %s3228_s1, 65536, %s2867_s22, [#allocation6], %s2795_s7, %s2795_s7, %s2796_s8  }
  0x28   : > { %s2663_s21 = scalar_lea.hbm %s3229_s2, 32 }
  0x29   : > { %p2664_p2 = scmp.ne.s32.totalorder %s3229_s2, %s2663_s21  ;;  %p2670_p10 = scmp.lt.u32.totalorder %s2663_s21, %s3229_s2 }
  0x2b   : > { %p2666_p1 = pnand %p2664_p2, %p2637_p13 }
  0x2d   : > { %p2667_p6 = pneg %p2666_p1 }
  0x2f   : > { %p2672_p3 = pnand %p2670_p10, %p2667_p6 }
  0x31   : > { %2675 = shalt.err (!%p2672_p3)
}
  0x32   : > { %s2676_s22 = scalar_lea.vmem %s2878_s25, 32  ;;  %p2684_p12 = scmp.lt.s32.totalorder %s2878_s25, %s2878_s25 }
  0x33   : > { %p2677_p5 = scmp.ne.s32.totalorder %s2878_s25, %s2676_s22  ;;  %p2685_p0 = scmp.lt.s32.totalorder %s2676_s22, %s2676_s22 }
  0x35   : > { %p2679_p7 = pnand %p2677_p5, %p2637_p13  ;;  %p2686_p2 = por %p2685_p0, %p2684_p12 }
  0x37   : > { %p2680_p9 = pneg %p2679_p7 }
  0x39   : > { %p2687_p1 = pnand %p2686_p2, %p2680_p9 }
  0x3b   : > { %2690 = shalt.err (!%p2687_p1)
}
  0x3c   : > { %2580 = dma.hbm_to_vmem [thread:$0]  (!%p2874_p11), %s3229_s2, 32, %s2878_s25, [#allocation6]  }
  0x3d   : > { %s2933_s4 = sadd.s32 1, %s2791_s15   ;;  %s27_s23 = sadd.s32 1, %s2787_s14 }
  0x3e   : > { %s24_s5 = ssub.s32 %s2791_s15, %s2933_s4  ;;  %p34_p13 = scmp.ne.s32.totalorder %s2787_s14, %s2783_s13 }
  0x3f   : > { %p25_p6 = scmp.eq.s32.totalorder %s24_s5, 0  ;;  %p35_p10 = scmp.eq.s32.totalorder %s2791_s15, 0 }
  0x40   : > { %p3238_p3 = scmp.eq.s32.totalorder %s2844_s16, 1  ;;  %p2591_p7 = scmp.lt.s32.totalorder %s2791_s15, 2 }
  0x41   : > { %s2949_s7 = scalar_select %p25_p6, %s2787_s14, %s27_s23  }
  0x42   : > { %p2943_p5 = por %p3238_p3, %p34_p13  ;;  %p36_p9 = por %p35_p10, %p34_p13 }
  0x43   : > { %s156_s8 = sand.u32 1, %s2787_s14   ;;  %s1919_s25 = sshll.u32 %s2791_s15, 14 }
  0x44   : > { %s3239_s6 = scalar_select %p2943_p5, 1, 0 }
  0x45   : > { %s1903_s9 = sshll.u32 %s156_s8, 10  ;;  %s2956_s17 = scalar_lea.hbm %s3227_s0, %s1919_s25 }
  0x46   : > { %s160_s21 = scalar_lea.vmem [#allocation2], %s1903_s9  ;;  %p2960_p11 = pnand %p2591_p7, %p36_p9 }
  0x47   : > { %s168_s24 = sshll.u32 %s160_s21, 4  ;;  %s2964_s27 = scalar_lea.sflag [#allocation3], %s156_s8  ;;  %s2958_s24 = int_to_ptr.vmem [resolvable:$true] %s168_s24 }
  0x48   : > { %s2691_s28 = scalar_lea.hbm %s2956_s17, 16384  ;;  %p2693_p0 = pneg %p2960_p11 }
  0x49   : > { %p2692_p12 = scmp.ne.s32.totalorder %s2956_s17, %s2691_s28  ;;  %s2696_s30 = scalar_lea.hbm %s3227_s0, 32768 }
  0x4a   : > { %p2697_p13 = scmp.lt.u32.totalorder %s2956_s17, %s3227_s0  ;;  %p2698_p6 = scmp.lt.u32.totalorder %s2696_s30, %s2691_s28 }
  0x4b   : > { %p2694_p2 = pnand %p2693_p0, %p2692_p12  ;;  %p2700_p3 = scmp.lt.u32.totalorder %s2691_s28, %s2956_s17 }
  0x4c   : > { %p2699_p10 = por %p2698_p6, %p2697_p13 }
  0x4d   : > { %p2695_p1 = pneg %p2694_p2 }
  0x4e   : > { %p2701_p7 = por %p2700_p3, %p2699_p10 }
  0x50   : > { %p2702_p9 = pnand %p2701_p7, %p2695_p1 }
  0x52   : > { %2705 = shalt.err (!%p2702_p9)
}
  0x53   : > { %s2706_s8 = scalar_lea.vmem %s2958_s24, 16384  ;;  %s2797_s9 = smov [#allocation2]  }
  0x54   : > { %p2707_p12 = scmp.ne.s32.totalorder %s2958_s24, %s2706_s8  ;;  %s2711_s25 = sshll.u32 %s2797_s9, 4  ;;  %s2712_s25 = int_to_ptr.vmem [resolvable:$false] %s2711_s25 }
  0x55   : > { %s2713_s10 = scalar_lea.vmem %s2712_s25, 32768  ;;  %p2714_p4 = scmp.lt.s32.totalorder %s2958_s24, %s2712_s25 }
  0x56   : > { %p2709_p2 = pnand %p2707_p12, %p2693_p0  ;;  %p2715_p13 = scmp.lt.s32.totalorder %s2713_s10, %s2706_s8 }
  0x58   : > { %p2710_p5 = pneg %p2709_p2  ;;  %p2716_p6 = por %p2715_p13, %p2714_p4 }
  0x5a   : > { %p2717_p10 = pnand %p2716_p6, %p2710_p5 }
  0x5c   : > { %2720 = shalt.err (!%p2717_p10)
}
  0x5d   : > { %s2798_s11 = smov 2048   ;;  %s2799_s21 = smov 128  }
  0x5e   : > { %2584 = dma.hbm_to_vmem [thread:$0]  (!%p2960_p11), %s2956_s17, 16384, %s2958_s24, %s2964_s27, %s2798_s11, %s2798_s11, %s2799_s21  }
  0x5f   : > { %180 = sbr.rel (%p2863_p8) target bundleno = 626 (0x272), region = 32  ;;  %s2995_s28 = sand.u32 (!%p2863_p8), 1, %s2783_s13  }
  0x60   : > { %s1908_s22 = sshll.u32 (!%p2863_p8), %s2995_s28, 10  ;;  %s183_s29 = scalar_lea.sflag (!%p2863_p8), [#allocation3], %s2995_s28 }
  0x61   : > { %s2999_s30 = scalar_lea.vmem (!%p2863_p8), [#allocation2], %s1908_s22  ;;  %p3241_p4 = scmp.ne.s32.totalorder (!%p2863_p8), %s3234_s18, 0 }
  0x66   : > { %2766 = dma.done.wait (%p3241_p4), %s183_s29, 16384  }
  0x67   : > { %2768 = vsyncadd (%p3241_p4), %s183_s29, 4294950912  ;;  %p3242_p5 = scmp.eq.s32.totalorder %s2844_s16, 0 }
  0x69   : > { %2770 = dma.done.wait (%p3242_p5), [#allocation6], 65568   ;;  %p3243_p8 = pmov %p3242_p5 }
  0x6a   : > { %v348_v0 = vld [vmem:[#allocation5 + $0x8] sm:$0xff]  ;;  %v350_v1 = vld [vmem:[#allocation5 + $0x18] sm:$0xff]  ;;  %v347_v5 = vld [vmem:[#allocation5] sm:$0xff]  ;;  %s1911_s18 = sshll.u32 %s2995_s28, 7  ;;  %s1921_s17 = sshll.u32 %s2844_s16, 11 }
  0x6b   : > { %2772 = vsyncadd (%p3243_p8), [#allocation6], 4294901728  ;;  %v604_v2 = vld [vmem:[#allocation5 + $0x808] sm:$0xff]  ;;  %v1922_v3 = vpack.c.bf16 %v350_v1, %v348_v0  ;;  %v606_v4 = vld [vmem:[#allocation5 + $0x818] sm:$0xff]  ;;  %s3144_s20 = scalar_lea.vmem [#allocation8], %s1911_s18  ;;  %s3179_s23 = scalar_lea.hbm %s3230_s3, %s1921_s17 }
  0x6c   : > { %v349_v6 = vld [vmem:[#allocation5 + $0x10] sm:$0xff]  ;;  %v2178_v7 = vpack.c.bf16 %v606_v4, %v604_v2  ;;  %v603_v9 = vld [vmem:[#allocation5 + $0x800] sm:$0xff]  ;;  %v352_v11 = vld [vmem:[#allocation5 + $0x28] sm:$0xff]  ;;  %s1806_s24 = sshll.u32 %s3144_s20, 4  ;;  %s1792_s16 = scalar_lea.sflag [#allocation4], %s2995_s28  ;;  %s3181_s24 = int_to_ptr.vmem [resolvable:$true] %s1806_s24 }
  0x6d   : > { %v1924_v8 = vpack.c.bf16 %v349_v6, %v347_v5  ;;  %v605_v10 = vld [vmem:[#allocation5 + $0x810] sm:$0xff]  ;;  %1923 = vmatprep.subr.bf16.mxu1 %v1922_v3  ;;  %v354_v13 = vld [vmem:[#allocation5 + $0x38] sm:$0xff]  ;;  %v608_v14 = vld [vmem:[#allocation5 + $0x828] sm:$0xff]  ;;  %s2721_s5 = scalar_lea.vmem %s3181_s24, 2048  ;;  %p3244_p0 = scmp.ne.s32.totalorder %s3239_s6, 0 }
  0x6e   : > { %v2180_v12 = vpack.c.bf16 %v605_v10, %v603_v9  ;;  %v610_v15 = vld [vmem:[#allocation5 + $0x838] sm:$0xff]  ;;  %2179 = vmatprep.subr.bf16.mxu0 %v2178_v7  ;;  %v1926_v16 = vpack.c.bf16 %v354_v13, %v352_v11  ;;  %v351_v18 = vld [vmem:[#allocation5 + $0x20] sm:$0xff]  ;;  %v353_v19 = vld [vmem:[#allocation5 + $0x30] sm:$0xff]  ;;  %p2722_p11 = scmp.ne.s32.totalorder %s3181_s24, %s2721_s5  ;;  %s2800_s8 = smov [#allocation8]  }
  0x6f   : > { %1925 = vmatpush1.bf16.msra.mxu1 %v1924_v8  ;;  %v2182_v17 = vpack.c.bf16 %v610_v15, %v608_v14  ;;  %v607_v20 = vld [vmem:[#allocation5 + $0x820] sm:$0xff]  ;;  %v1928_v21 = vpack.c.bf16 %v353_v19, %v351_v18  ;;  %v609_v22 = vld [vmem:[#allocation5 + $0x830] sm:$0xff]  ;;  %v356_v23 = vld [vmem:[#allocation5 + $0x48] sm:$0xff]  ;;  %s2725_s9 = sshll.u32 %s2800_s8, 4  ;;  %s2726_s9 = int_to_ptr.vmem [resolvable:$false] %s2725_s9 }
  0x70   : > { %2181 = vmatpush1.bf16.msra.mxu0 %v2180_v12  ;;  %v358_v24 = vld [vmem:[#allocation5 + $0x58] sm:$0xff]  ;;  %1927 = vmatprep.subr.bf16.mxu1 %v1926_v16  ;;  %v2184_v25 = vpack.c.bf16 %v609_v22, %v607_v20  ;;  %v612_v27 = vld [vmem:[#allocation5 + $0x848] sm:$0xff]  ;;  %v355_v29 = vld [vmem:[#allocation5 + $0x40] sm:$0xff]  ;;  %p2723_p1 = pnand %p2722_p11, %p3244_p0  ;;  %s2727_s25 = scalar_lea.vmem %s2726_s9, 4096 }
  0x71   : > { %2183 = vmatprep.subr.bf16.mxu0 %v2182_v17  ;;  %v1930_v26 = vpack.c.bf16 %v358_v24, %v356_v23  ;;  %v614_v28 = vld [vmem:[#allocation5 + $0x858] sm:$0xff]  ;;  %v357_v31 = vld [vmem:[#allocation5 + $0x50] sm:$0xff]  ;;  %v611_v32 = vld [vmem:[#allocation5 + $0x840] sm:$0xff]  ;;  %p2728_p7 = scmp.lt.s32.totalorder %s3181_s24, %s2726_s9  ;;  %p2729_p9 = scmp.lt.s32.totalorder %s2727_s25, %s2721_s5 }
  0x72   : > { %v2186_v30 = vpack.c.bf16 %v614_v28, %v612_v27  ;;  %v613_v33 = vld [vmem:[#allocation5 + $0x850] sm:$0xff]  ;;  %v1932_v34 = vpack.c.bf16 %v357_v31, %v355_v29  ;;  %v360_v35 = vld [vmem:[#allocation5 + $0x68] sm:$0xff]  ;;  %v362_v36 = vld [vmem:[#allocation5 + $0x78] sm:$0xff]  ;;  %p2724_p3 = pneg %p2723_p1 }
  0x73   : > { %1929 = vmatpush1.bf16.msra.mxu1 %v1928_v21  ;;  %v616_v37 = vld [vmem:[#allocation5 + $0x868] sm:$0xff]  ;;  %v2188_v38 = vpack.c.bf16 %v613_v33, %v611_v32  ;;  %v1934_v39 = vpack.c.bf16 %v362_v36, %v360_v35  ;;  %v618_v40 = vld [vmem:[#allocation5 + $0x878] sm:$0xff]  ;;  %v359_v41 = vld [vmem:[#allocation5 + $0x60] sm:$0xff]  ;;  %p2730_p12 = por %p2729_p9, %p2728_p7 }
  0x74   : > { %2185 = vmatpush1.bf16.msra.mxu0 %v2184_v25  ;;  %1931 = vmatprep.subr.bf16.mxu1 %v1930_v26  ;;  %v361_v42 = vld [vmem:[#allocation5 + $0x70] sm:$0xff]  ;;  %v2190_v43 = vpack.c.bf16 %v618_v40, %v616_v37  ;;  %v615_v44 = vld [vmem:[#allocation5 + $0x860] sm:$0xff]  ;;  %v364_v46 = vld [vmem:[#allocation5 + $0x88] sm:$0xff] }
  0x75   : > { %2187 = vmatprep.subr.bf16.mxu0 %v2186_v30  ;;  %v617_v45 = vld [vmem:[#allocation5 + $0x870] sm:$0xff]  ;;  %v366_v47 = vld [vmem:[#allocation5 + $0x98] sm:$0xff]  ;;  %v620_v48 = vld [vmem:[#allocation5 + $0x888] sm:$0xff]  ;;  %v1936_v50 = vpack.c.bf16 %v361_v42, %v359_v41  ;;  %p2731_p2 = pnand %p2730_p12, %p2724_p3 }
  0x76   : > { %v622_v49 = vld [vmem:[#allocation5 + $0x898] sm:$0xff]  ;;  %v2192_v51 = vpack.c.bf16 %v617_v45, %v615_v44  ;;  %v1938_v52 = vpack.c.bf16 %v366_v47, %v364_v46  ;;  %v363_v53 = vld [vmem:[#allocation5 + $0x80] sm:$0xff]  ;;  %v365_v54 = vld [vmem:[#allocation5 + $0x90] sm:$0xff] }
  0x77   : > { %1933 = vmatpush1.bf16.msra.mxu1 %v1932_v34  ;;  %v619_v55 = vld [vmem:[#allocation5 + $0x880] sm:$0xff]  ;;  %v2194_v56 = vpack.c.bf16 %v622_v49, %v620_v48  ;;  %v621_v57 = vld [vmem:[#allocation5 + $0x890] sm:$0xff]  ;;  %v368_v58 = vld [vmem:[#allocation5 + $0xa8] sm:$0xff]  ;;  %v1940_v62 = vpack.c.bf16 %v365_v54, %v363_v53 }
  0x78   : > { %2189 = vmatpush1.bf16.msra.mxu0 %v2188_v38  ;;  %1935 = vmatprep.subr.bf16.mxu1 %v1934_v39  ;;  %v370_v59 = vld [vmem:[#allocation5 + $0xb8] sm:$0xff]  ;;  %v624_v60 = vld [vmem:[#allocation5 + $0x8a8] sm:$0xff]  ;;  %v2196_v63 = vpack.c.bf16 %v621_v57, %v619_v55  ;;  %v367_v1 = vld [vmem:[#allocation5 + $0xa0] sm:$0xff] }
  0x79   : > { %2191 = vmatprep.subr.bf16.mxu0 %v2190_v43  ;;  %v626_v61 = vld [vmem:[#allocation5 + $0x8b8] sm:$0xff]  ;;  %v1942_v0 = vpack.c.bf16 %v370_v59, %v368_v58  ;;  %v369_v2 = vld [vmem:[#allocation5 + $0xb0] sm:$0xff]  ;;  %v623_v3 = vld [vmem:[#allocation5 + $0x8a0] sm:$0xff] }
  0x7a   : > { %v2198_v4 = vpack.c.bf16 %v626_v61, %v624_v60  ;;  %v625_v5 = vld [vmem:[#allocation5 + $0x8b0] sm:$0xff]  ;;  %v372_v6 = vld [vmem:[#allocation5 + $0xc8] sm:$0xff]  ;;  %v374_v7 = vld [vmem:[#allocation5 + $0xd8] sm:$0xff]  ;;  %v1944_v10 = vpack.c.bf16 %v369_v2, %v367_v1 }
  0x7b   : > { %1937 = vmatpush1.bf16.msra.mxu1 %v1936_v50  ;;  %v628_v8 = vld [vmem:[#allocation5 + $0x8c8] sm:$0xff]  ;;  %v630_v9 = vld [vmem:[#allocation5 + $0x8d8] sm:$0xff]  ;;  %v2200_v11 = vpack.c.bf16 %v625_v5, %v623_v3  ;;  %v1946_v12 = vpack.c.bf16 %v374_v7, %v372_v6  ;;  %v371_v13 = vld [vmem:[#allocation5 + $0xc0] sm:$0xff] }
  0x7c   : > { %2193 = vmatpush1.bf16.msra.mxu0 %v2192_v51  ;;  %1939 = vmatprep.subr.bf16.mxu1 %v1938_v52  ;;  %v373_v14 = vld [vmem:[#allocation5 + $0xd0] sm:$0xff]  ;;  %v627_v15 = vld [vmem:[#allocation5 + $0x8c0] sm:$0xff]  ;;  %v2202_v16 = vpack.c.bf16 %v630_v9, %v628_v8  ;;  %v376_v18 = vld [vmem:[#allocation5 + $0xe8] sm:$0xff] }
  0x7d   : > { %2195 = vmatprep.subr.bf16.mxu0 %v2194_v56  ;;  %v629_v17 = vld [vmem:[#allocation5 + $0x8d0] sm:$0xff]  ;;  %v378_v19 = vld [vmem:[#allocation5 + $0xf8] sm:$0xff]  ;;  %v632_v20 = vld [vmem:[#allocation5 + $0x8e8] sm:$0xff]  ;;  %v1948_v22 = vpack.c.bf16 %v373_v14, %v371_v13 }
  0x7e   : > { %v634_v21 = vld [vmem:[#allocation5 + $0x8f8] sm:$0xff]  ;;  %v2204_v23 = vpack.c.bf16 %v629_v17, %v627_v15  ;;  %v1950_v24 = vpack.c.bf16 %v378_v19, %v376_v18  ;;  %v375_v25 = vld [vmem:[#allocation5 + $0xe0] sm:$0xff]  ;;  %v377_v26 = vld [vmem:[#allocation5 + $0xf0] sm:$0xff] }
  0x7f   : > { %1941 = vmatpush1.bf16.msra.mxu1 %v1940_v62  ;;  %v631_v27 = vld [vmem:[#allocation5 + $0x8e0] sm:$0xff]  ;;  %v2206_v28 = vpack.c.bf16 %v634_v21, %v632_v20  ;;  %v633_v29 = vld [vmem:[#allocation5 + $0x8f0] sm:$0xff]  ;;  %v380_v30 = vld [vmem:[#allocation5 + $0x108] sm:$0xff]  ;;  %v1952_v34 = vpack.c.bf16 %v377_v26, %v375_v25 }
  0x80   : > { %2197 = vmatpush1.bf16.msra.mxu0 %v2196_v63  ;;  %1943 = vmatprep.subr.bf16.mxu1 %v1942_v0  ;;  %v382_v31 = vld [vmem:[#allocation5 + $0x118] sm:$0xff]  ;;  %v636_v32 = vld [vmem:[#allocation5 + $0x908] sm:$0xff]  ;;  %v2208_v35 = vpack.c.bf16 %v633_v29, %v631_v27  ;;  %v379_v37 = vld [vmem:[#allocation5 + $0x100] sm:$0xff] }
  0x81   : > { %2199 = vmatprep.subr.bf16.mxu0 %v2198_v4  ;;  %v638_v33 = vld [vmem:[#allocation5 + $0x918] sm:$0xff]  ;;  %v1954_v36 = vpack.c.bf16 %v382_v31, %v380_v30  ;;  %v381_v38 = vld [vmem:[#allocation5 + $0x110] sm:$0xff]  ;;  %v635_v39 = vld [vmem:[#allocation5 + $0x900] sm:$0xff] }
  0x82   : > { %v2210_v40 = vpack.c.bf16 %v638_v33, %v636_v32  ;;  %v637_v41 = vld [vmem:[#allocation5 + $0x910] sm:$0xff]  ;;  %v384_v42 = vld [vmem:[#allocation5 + $0x128] sm:$0xff]  ;;  %v386_v43 = vld [vmem:[#allocation5 + $0x138] sm:$0xff]  ;;  %v1956_v46 = vpack.c.bf16 %v381_v38, %v379_v37 }
  0x83   : > { %1945 = vmatpush1.bf16.msra.mxu1 %v1944_v10  ;;  %v640_v44 = vld [vmem:[#allocation5 + $0x928] sm:$0xff]  ;;  %v642_v45 = vld [vmem:[#allocation5 + $0x938] sm:$0xff]  ;;  %v2212_v47 = vpack.c.bf16 %v637_v41, %v635_v39  ;;  %v1958_v48 = vpack.c.bf16 %v386_v43, %v384_v42  ;;  %v383_v49 = vld [vmem:[#allocation5 + $0x120] sm:$0xff] }
  0x84   : > { %2201 = vmatpush1.bf16.msra.mxu0 %v2200_v11  ;;  %1947 = vmatprep.subr.bf16.mxu1 %v1946_v12  ;;  %v385_v50 = vld [vmem:[#allocation5 + $0x130] sm:$0xff]  ;;  %v639_v51 = vld [vmem:[#allocation5 + $0x920] sm:$0xff]  ;;  %v2214_v52 = vpack.c.bf16 %v642_v45, %v640_v44  ;;  %v388_v54 = vld [vmem:[#allocation5 + $0x148] sm:$0xff] }
  0x85   : > { %2203 = vmatprep.subr.bf16.mxu0 %v2202_v16  ;;  %v641_v53 = vld [vmem:[#allocation5 + $0x930] sm:$0xff]  ;;  %v390_v55 = vld [vmem:[#allocation5 + $0x158] sm:$0xff]  ;;  %v644_v56 = vld [vmem:[#allocation5 + $0x948] sm:$0xff]  ;;  %v1960_v58 = vpack.c.bf16 %v385_v50, %v383_v49 }
  0x86   : > { %v646_v57 = vld [vmem:[#allocation5 + $0x958] sm:$0xff]  ;;  %v2216_v59 = vpack.c.bf16 %v641_v53, %v639_v51  ;;  %v1962_v60 = vpack.c.bf16 %v390_v55, %v388_v54  ;;  %v387_v61 = vld [vmem:[#allocation5 + $0x140] sm:$0xff]  ;;  %v389_v62 = vld [vmem:[#allocation5 + $0x150] sm:$0xff] }
  0x87   : > { %1949 = vmatpush1.bf16.msra.mxu1 %v1948_v22  ;;  %v643_v63 = vld [vmem:[#allocation5 + $0x940] sm:$0xff]  ;;  %v2218_v0 = vpack.c.bf16 %v646_v57, %v644_v56  ;;  %v645_v1 = vld [vmem:[#allocation5 + $0x950] sm:$0xff]  ;;  %v392_v2 = vld [vmem:[#allocation5 + $0x168] sm:$0xff]  ;;  %v1964_v6 = vpack.c.bf16 %v389_v62, %v387_v61 }
  0x88   : > { %2205 = vmatpush1.bf16.msra.mxu0 %v2204_v23  ;;  %1951 = vmatprep.subr.bf16.mxu1 %v1950_v24  ;;  %v394_v3 = vld [vmem:[#allocation5 + $0x178] sm:$0xff]  ;;  %v648_v4 = vld [vmem:[#allocation5 + $0x968] sm:$0xff]  ;;  %v391_v7 = vld [vmem:[#allocation5 + $0x160] sm:$0xff]  ;;  %v2220_v8 = vpack.c.bf16 %v645_v1, %v643_v63 }
  0x89   : > { %2207 = vmatprep.subr.bf16.mxu0 %v2206_v28  ;;  %v650_v5 = vld [vmem:[#allocation5 + $0x978] sm:$0xff]  ;;  %v1966_v9 = vpack.c.bf16 %v394_v3, %v392_v2  ;;  %v393_v10 = vld [vmem:[#allocation5 + $0x170] sm:$0xff]  ;;  %v647_v11 = vld [vmem:[#allocation5 + $0x960] sm:$0xff] }
  0x8a   : > { %v649_v12 = vld [vmem:[#allocation5 + $0x970] sm:$0xff]  ;;  %v2222_v13 = vpack.c.bf16 %v650_v5, %v648_v4  ;;  %v396_v14 = vld [vmem:[#allocation5 + $0x188] sm:$0xff]  ;;  %v398_v15 = vld [vmem:[#allocation5 + $0x198] sm:$0xff]  ;;  %v1968_v20 = vpack.c.bf16 %v393_v10, %v391_v7 }
  0x8b   : > { %1953 = vmatpush1.bf16.msra.mxu1 %v1952_v34  ;;  %v220_v16 = vld [vmem:[%s2999_s30 + $0x8] sm:$0xff]  ;;  %v654_v18 = vld [vmem:[#allocation5 + $0x998] sm:$0xff]  ;;  %v2224_v21 = vpack.c.bf16 %v649_v12, %v647_v11  ;;  %v1970_v22 = vpack.c.bf16 %v398_v15, %v396_v14  ;;  %v395_v23 = vld [vmem:[#allocation5 + $0x180] sm:$0xff] }
  0x8c   : > { %2209 = vmatpush1.bf16.msra.mxu0 %v2208_v35  ;;  %1955 = vmatprep.subr.bf16.mxu1 %v1954_v36  ;;  %v652_v17 = vld [vmem:[#allocation5 + $0x988] sm:$0xff]  ;;  %v397_v24 = vld [vmem:[#allocation5 + $0x190] sm:$0xff]  ;;  %v651_v25 = vld [vmem:[#allocation5 + $0x980] sm:$0xff] }
  0x8d   : > { %2211 = vmatprep.subr.bf16.mxu0 %v2210_v40  ;;  %935 = vmatprep.mubr.f32.mxu1 %v220_v16  ;;  %v228_v19 = vld [vmem:[%s2999_s30 + $0x48] sm:$0xff]  ;;  %v2226_v26 = vpack.c.bf16 %v654_v18, %v652_v17  ;;  %v653_v27 = vld [vmem:[#allocation5 + $0x990] sm:$0xff]  ;;  %v402_v29 = vld [vmem:[#allocation5 + $0x1b8] sm:$0xff]  ;;  %v1972_v32 = vpack.c.bf16 %v397_v24, %v395_v23 }
  0x8e   : > { %1387 = vmatprep.mubr.f32.mxu0 %v228_v19  ;;  %v400_v28 = vld [vmem:[#allocation5 + $0x1a8] sm:$0xff]  ;;  %v658_v31 = vld [vmem:[#allocation5 + $0x9b8] sm:$0xff]  ;;  %v2228_v33 = vpack.c.bf16 %v653_v27, %v651_v25  ;;  %v399_v35 = vld [vmem:[#allocation5 + $0x1a0] sm:$0xff] }
  0x8f   : > { %1957 = vmatpush1.bf16.msra.mxu1 %v1956_v46  ;;  %v656_v30 = vld [vmem:[#allocation5 + $0x9a8] sm:$0xff]  ;;  %v1974_v34 = vpack.c.bf16 %v402_v29, %v400_v28  ;;  %v401_v36 = vld [vmem:[#allocation5 + $0x1b0] sm:$0xff]  ;;  %v655_v37 = vld [vmem:[#allocation5 + $0x9a0] sm:$0xff] }
  0x90   : > { %2213 = vmatpush1.bf16.msra.mxu0 %v2212_v47  ;;  %1959 = vmatprep.subr.bf16.mxu1 %v1958_v48  ;;  %v2230_v38 = vpack.c.bf16 %v658_v31, %v656_v30  ;;  %v657_v39 = vld [vmem:[#allocation5 + $0x9b0] sm:$0xff]  ;;  %v404_v40 = vld [vmem:[#allocation5 + $0x1c8] sm:$0xff]  ;;  %v406_v41 = vld [vmem:[#allocation5 + $0x1d8] sm:$0xff]  ;;  %v1976_v44 = vpack.c.bf16 %v401_v36, %v399_v35 }
  0x91   : > { %2215 = vmatprep.subr.bf16.mxu0 %v2214_v52  ;;  %v660_v42 = vld [vmem:[#allocation5 + $0x9c8] sm:$0xff]  ;;  %v662_v43 = vld [vmem:[#allocation5 + $0x9d8] sm:$0xff]  ;;  %v2232_v45 = vpack.c.bf16 %v657_v39, %v655_v37  ;;  %v1978_v46 = vpack.c.bf16 %v406_v41, %v404_v40  ;;  %v403_v47 = vld [vmem:[#allocation5 + $0x1c0] sm:$0xff] }
  0x92   : > { %v405_v48 = vld [vmem:[#allocation5 + $0x1d0] sm:$0xff]  ;;  %v659_v49 = vld [vmem:[#allocation5 + $0x9c0] sm:$0xff]  ;;  %v2234_v50 = vpack.c.bf16 %v662_v43, %v660_v42  ;;  %v408_v52 = vld [vmem:[#allocation5 + $0x1e8] sm:$0xff] }
  0x93   : > { %1961 = vmatpush1.bf16.msra.mxu1 %v1960_v58  ;;  %v661_v51 = vld [vmem:[#allocation5 + $0x9d0] sm:$0xff]  ;;  %v410_v53 = vld [vmem:[#allocation5 + $0x1f8] sm:$0xff]  ;;  %v664_v54 = vld [vmem:[#allocation5 + $0x9e8] sm:$0xff]  ;;  %v1980_v56 = vpack.c.bf16 %v405_v48, %v403_v47 }
  0x94   : > { %2217 = vmatpush1.bf16.msra.mxu0 %v2216_v59  ;;  %1963 = vmatprep.subr.bf16.mxu1 %v1962_v60  ;;  %v666_v55 = vld [vmem:[#allocation5 + $0x9f8] sm:$0xff]  ;;  %v2236_v57 = vpack.c.bf16 %v661_v51, %v659_v49  ;;  %v1982_v58 = vpack.c.bf16 %v410_v53, %v408_v52  ;;  %v407_v59 = vld [vmem:[#allocation5 + $0x1e0] sm:$0xff]  ;;  %v409_v60 = vld [vmem:[#allocation5 + $0x1f0] sm:$0xff] }
  0x95   : > { %2219 = vmatprep.subr.bf16.mxu0 %v2218_v0  ;;  %v663_v61 = vld [vmem:[#allocation5 + $0x9e0] sm:$0xff]  ;;  %v2238_v62 = vpack.c.bf16 %v666_v55, %v664_v54  ;;  %v665_v63 = vld [vmem:[#allocation5 + $0x9f0] sm:$0xff]  ;;  %v412_v0 = vld [vmem:[#allocation5 + $0x208] sm:$0xff]  ;;  %v1984_v4 = vpack.c.bf16 %v409_v60, %v407_v59 }
  0x96   : > { %v414_v1 = vld [vmem:[#allocation5 + $0x218] sm:$0xff]  ;;  %v668_v2 = vld [vmem:[#allocation5 + $0xa08] sm:$0xff]  ;;  %v2240_v5 = vpack.c.bf16 %v665_v63, %v663_v61  ;;  %v411_v7 = vld [vmem:[#allocation5 + $0x200] sm:$0xff] }
  0x97   : > { %1965 = vmatpush1.bf16.msra.mxu1 %v1964_v6  ;;  %v670_v3 = vld [vmem:[#allocation5 + $0xa18] sm:$0xff]  ;;  %v1986_v6 = vpack.c.bf16 %v414_v1, %v412_v0  ;;  %v669_v11 = vld [vmem:[#allocation5 + $0xa10] sm:$0xff]  ;;  %v416_v12 = vld [vmem:[#allocation5 + $0x228] sm:$0xff] }
  0x98   : > { %2221 = vmatpush1.bf16.msra.mxu0 %v2220_v8  ;;  %1967 = vmatprep.subr.bf16.mxu1 %v1966_v9  ;;  %v413_v8 = vld [vmem:[#allocation5 + $0x210] sm:$0xff]  ;;  %v667_v9 = vld [vmem:[#allocation5 + $0xa00] sm:$0xff]  ;;  %v2242_v10 = vpack.c.bf16 %v670_v3, %v668_v2  ;;  %v672_v14 = vld [vmem:[#allocation5 + $0xa28] sm:$0xff] }
  0x99   : > { %2223 = vmatprep.subr.bf16.mxu0 %v2222_v13  ;;  %v418_v13 = vld [vmem:[#allocation5 + $0x238] sm:$0xff]  ;;  %v219_v16 = vld [vmem:[%s2999_s30] sm:$0xff]  ;;  %v1988_v17 = vpack.c.bf16 %v413_v8, %v411_v7  ;;  %v2244_v19 = vpack.c.bf16 %v669_v11, %v667_v9  ;;  %v673_v25 = vld [vmem:[#allocation5 + $0xa30] sm:$0xff] }
  0x9a   : > { %v674_v15 = vld [vmem:[#allocation5 + $0xa38] sm:$0xff]  ;;  %v227_v18 = vld [vmem:[%s2999_s30 + $0x40] sm:$0xff]  ;;  %v676_v28 = vld [vmem:[#allocation5 + $0xa48] sm:$0xff] }
  0x9b   : > { %1969 = vmatpush1.bf16.msra.mxu1 %v1968_v20  ;;  %v1990_v20 = vpack.c.bf16 %v418_v13, %v416_v12  ;;  %v671_v23 = vld [vmem:[#allocation5 + $0xa20] sm:$0xff]  ;;  %v2246_v24 = vpack.c.bf16 %v674_v15, %v672_v14  ;;  %v422_v27 = vld [vmem:[#allocation5 + $0x258] sm:$0xff]  ;;  %v677_v37 = vld [vmem:[#allocation5 + $0xa50] sm:$0xff] }
  0x9c   : > { %2225 = vmatpush1.bf16.msra.mxu0 %v2224_v21  ;;  %1971 = vmatprep.subr.bf16.mxu1 %v1970_v22  ;;  %v415_v21 = vld [vmem:[#allocation5 + $0x220] sm:$0xff]  ;;  %v417_v22 = vld [vmem:[#allocation5 + $0x230] sm:$0xff]  ;;  %v678_v29 = vld [vmem:[#allocation5 + $0xa58] sm:$0xff] }
  0x9d   : > { %2227 = vmatprep.subr.bf16.mxu0 %v2226_v26  ;;  %v420_v26 = vld [vmem:[#allocation5 + $0x248] sm:$0xff]  ;;  %v1992_v30 = vpack.c.bf16 %v417_v22, %v415_v21  ;;  %v419_v31 = vld [vmem:[#allocation5 + $0x240] sm:$0xff]  ;;  %v2250_v39 = vpack.c.bf16 %v678_v29, %v676_v28  ;;  %v426_v41 = vld [vmem:[#allocation5 + $0x278] sm:$0xff] }
  0x9e   : > { %v1994_v35 = vpack.c.bf16 %v422_v27, %v420_v26  ;;  %v675_v36 = vld [vmem:[#allocation5 + $0xa40] sm:$0xff]  ;;  %v424_v40 = vld [vmem:[#allocation5 + $0x268] sm:$0xff]  ;;  %v425_v48 = vld [vmem:[#allocation5 + $0x270] sm:$0xff] }
  0x9f   : > { %1973 = vmatpush1.bf16.msra.mxu1 %v1972_v32  ;;  %v421_v32 = vld [vmem:[#allocation5 + $0x250] sm:$0xff]  ;;  %v235_v42 = vld [vmem:[%s2999_s30 + $0x80] sm:$0xff]  ;;  %v680_v43 = vld [vmem:[#allocation5 + $0xa68] sm:$0xff]  ;;  %v1998_v51 = vpack.c.bf16 %v426_v41, %v424_v40 }
  0xa0   : > { %2229 = vmatpush1.bf16.msra.mxu0 %v2228_v33  ;;  %1975 = vmatprep.subr.bf16.mxu1 %v1974_v34  ;;  %v236_v33 = vld [vmem:[%s2999_s30 + $0x88] sm:$0xff]  ;;  %v2248_v34 = vpack.c.bf16 %v673_v25, %v671_v23  ;;  %v423_v47 = vld [vmem:[#allocation5 + $0x260] sm:$0xff]  ;;  %v681_v53 = vld [vmem:[#allocation5 + $0xa70] sm:$0xff] }
  0xa1   : > { %2231 = vmatprep.subr.bf16.mxu0 %v2230_v38  ;;  %v244_v38 = vld [vmem:[%s2999_s30 + $0xc8] sm:$0xff]  ;;  %v679_v52 = vld [vmem:[#allocation5 + $0xa60] sm:$0xff]  ;;  %v686_v60 = vld [vmem:[#allocation5 + $0xa98] sm:$0xff] }
  0xa2   : > { %v252_v49 = vld [vmem:[%s2999_s30 + $0x108] sm:$0xff]  ;;  %v259_v61 = vld [vmem:[%s2999_s30 + $0x140] sm:$0xff]  ;;  %v429_v0 = vld [vmem:[#allocation5 + $0x290] sm:$0xff]  ;;  %v2256_v2 = vpack.c.bf16 %v681_v53, %v679_v52 }
  0xa3   : > { %1977 = vmatpush1.bf16.msra.mxu1 %v1976_v44  ;;  %v682_v44 = vld [vmem:[#allocation5 + $0xa78] sm:$0xff]  ;;  %v260_v54 = vld [vmem:[%s2999_s30 + $0x148] sm:$0xff]  ;;  %v427_v63 = vld [vmem:[#allocation5 + $0x280] sm:$0xff] }
  0xa4   : > { %2233 = vmatpush1.bf16.msra.mxu0 %v2232_v45  ;;  %1979 = vmatprep.subr.bf16.mxu1 %v1978_v46  ;;  %v243_v45 = vld [vmem:[%s2999_s30 + $0xc0] sm:$0xff]  ;;  %v1996_v46 = vpack.c.bf16 %v421_v32, %v419_v31  ;;  %v2254_v55 = vpack.c.bf16 %v682_v44, %v680_v43  ;;  %v684_v59 = vld [vmem:[#allocation5 + $0xa88] sm:$0xff]  ;;  %v434_v9 = vld [vmem:[#allocation5 + $0x2b8] sm:$0xff]  ;;  %v2004_v14 = vpack.c.bf16 %v429_v0, %v427_v63 }
  0xa5   : > { %2235 = vmatprep.subr.bf16.mxu0 %v2234_v50  ;;  %v2252_v50 = vpack.c.bf16 %v677_v37, %v675_v36  ;;  %v268_v1 = vld [vmem:[%s2999_s30 + $0x188] sm:$0xff]  ;;  %v2258_v7 = vpack.c.bf16 %v686_v60, %v684_v59  ;;  %v690_v12 = vld [vmem:[#allocation5 + $0xab8] sm:$0xff]  ;;  %v275_v13 = vld [vmem:[%s2999_s30 + $0x1c0] sm:$0xff] }
  0xa6   : > { %v432_v8 = vld [vmem:[#allocation5 + $0x2a8] sm:$0xff]  ;;  %v431_v15 = vld [vmem:[#allocation5 + $0x2a0] sm:$0xff]  ;;  %v689_v21 = vld [vmem:[#allocation5 + $0xab0] sm:$0xff] }
  0xa7   : > { %1981 = vmatpush1.bf16.msra.mxu1 %v1980_v56  ;;  %v428_v56 = vld [vmem:[#allocation5 + $0x288] sm:$0xff]  ;;  %v438_v25 = vld [vmem:[#allocation5 + $0x2d8] sm:$0xff]  ;;  %v283_v26 = vld [vmem:[%s2999_s30 + $0x200] sm:$0xff] }
  0xa8   : > { %2237 = vmatpush1.bf16.msra.mxu0 %v2236_v57  ;;  %1983 = vmatprep.subr.bf16.mxu1 %v1982_v58  ;;  %v430_v57 = vld [vmem:[#allocation5 + $0x298] sm:$0xff]  ;;  %v251_v58 = vld [vmem:[%s2999_s30 + $0x100] sm:$0xff]  ;;  %v688_v11 = vld [vmem:[#allocation5 + $0xaa8] sm:$0xff] }
  0xa9   : > { %2239 = vmatprep.subr.bf16.mxu0 %v2238_v62  ;;  %v2000_v62 = vpack.c.bf16 %v425_v48, %v423_v47  ;;  %v2002_v3 = vpack.c.bf16 %v430_v57, %v428_v56  ;;  %v292_v22 = vld [vmem:[%s2999_s30 + $0x248] sm:$0xff]  ;;  %v2262_v23 = vpack.c.bf16 %v690_v12, %v688_v11  ;;  %v694_v28 = vld [vmem:[#allocation5 + $0xad8] sm:$0xff]  ;;  %v291_v29 = vld [vmem:[%s2999_s30 + $0x240] sm:$0xff] }
  0xaa   : > { %v692_v27 = vld [vmem:[#allocation5 + $0xac8] sm:$0xff]  ;;  %v435_v31 = vld [vmem:[#allocation5 + $0x2c0] sm:$0xff]  ;;  %v437_v32 = vld [vmem:[#allocation5 + $0x2d0] sm:$0xff] }
  0xab   : > { %1985 = vmatpush1.bf16.msra.mxu1 %v1984_v4  ;;  %v683_v4 = vld [vmem:[#allocation5 + $0xa80] sm:$0xff]  ;;  %v693_v37 = vld [vmem:[#allocation5 + $0xad0] sm:$0xff]  ;;  %v440_v40 = vld [vmem:[#allocation5 + $0x2e8] sm:$0xff] }
  0xac   : > { %2241 = vmatpush1.bf16.msra.mxu0 %v2240_v5  ;;  %1987 = vmatprep.subr.bf16.mxu1 %v1986_v6  ;;  %v685_v5 = vld [vmem:[#allocation5 + $0xa90] sm:$0xff]  ;;  %v276_v6 = vld [vmem:[%s2999_s30 + $0x1c8] sm:$0xff]  ;;  %v691_v36 = vld [vmem:[#allocation5 + $0xac0] sm:$0xff] }
  0xad   : > { %2243 = vmatprep.subr.bf16.mxu0 %v2242_v10  ;;  %v267_v10 = vld [vmem:[%s2999_s30 + $0x180] sm:$0xff]  ;;  %v442_v41 = vld [vmem:[#allocation5 + $0x2f8] sm:$0xff]  ;;  %v696_v43 = vld [vmem:[#allocation5 + $0xae8] sm:$0xff] }
  0xae   : > { %936 = vmatmul.mubr.f32.vlgmr.msra.gmra.mrb[0].mxu1 %v219_v16  ;;  %v433_v16 = vld [vmem:[#allocation5 + $0x2b0] sm:$0xff]  ;;  %v698_v44 = vld [vmem:[#allocation5 + $0xaf8] sm:$0xff]  ;;  %v439_v47 = vld [vmem:[#allocation5 + $0x2e0] sm:$0xff] }
  0xaf   : > { %1989 = vmatpush1.bf16.msra.mxu1 %v1988_v17  ;;  %1388 = vmatmul.mubr.f32.vlgmr.msra.gmra.mrb[0].mxu0 %v227_v18  ;;  %v284_v17 = vld [vmem:[%s2999_s30 + $0x208] sm:$0xff]  ;;  %v2260_v18 = vpack.c.bf16 %v685_v5, %v683_v4  ;;  %v441_v48 = vld [vmem:[#allocation5 + $0x2f0] sm:$0xff]  ;;  %v695_v52 = vld [vmem:[#allocation5 + $0xae0] sm:$0xff] }
  0xb0   : > { %2245 = vmatpush1.bf16.msra.mxu0 %v2244_v19  ;;  %1991 = vmatprep.subr.bf16.mxu1 %v1990_v20  ;;  %v2006_v19 = vpack.c.bf16 %v434_v9, %v432_v8  ;;  %v687_v20 = vld [vmem:[#allocation5 + $0xaa0] sm:$0xff]  ;;  %v697_v53 = vld [vmem:[#allocation5 + $0xaf0] sm:$0xff]  ;;  %v444_v56 = vld [vmem:[#allocation5 + $0x308] sm:$0xff] }
  0xb1   : > { %2247 = vmatprep.subr.bf16.mxu0 %v2246_v24  ;;  %941 = vmatprep.mubr.f32.mxu1 %v236_v33  ;;  %v436_v24 = vld [vmem:[#allocation5 + $0x2c8] sm:$0xff]  ;;  %v446_v57 = vld [vmem:[#allocation5 + $0x318] sm:$0xff]  ;;  %v443_v63 = vld [vmem:[#allocation5 + $0x300] sm:$0xff] }
  0xb2   : > { %1393 = vmatprep.mubr.f32.mxu0 %v244_v38  ;;  %942 = vmatmul.mubr.f32.gmra.mrb[2].mxu1 %v235_v42  ;;  %v300_v33 = vld [vmem:[%s2999_s30 + $0x288] sm:$0xff]  ;;  %v299_v42 = vld [vmem:[%s2999_s30 + $0x280] sm:$0xff]  ;;  %v702_v60 = vld [vmem:[#allocation5 + $0xb18] sm:$0xff] }
  0xb3   : > { %1993 = vmatpush1.bf16.msra.mxu1 %v1992_v30  ;;  %1394 = vmatmul.mubr.f32.gmra.mrb[2].mxu0 %v243_v45  ;;  %v2008_v30 = vpack.c.bf16 %v433_v16, %v431_v15  ;;  %v308_v38 = vld [vmem:[%s2999_s30 + $0x2c8] sm:$0xff]  ;;  %v307_v45 = vld [vmem:[%s2999_s30 + $0x2c0] sm:$0xff]  ;;  %v445_v0 = vld [vmem:[#allocation5 + $0x310] sm:$0xff] }
  0xb4   : > { %2249 = vmatpush1.bf16.msra.mxu0 %v2248_v34  ;;  %1995 = vmatprep.subr.bf16.mxu1 %v1994_v35  ;;  %v2264_v34 = vpack.c.bf16 %v689_v21, %v687_v20  ;;  %v2010_v35 = vpack.c.bf16 %v438_v25, %v436_v24  ;;  %v700_v59 = vld [vmem:[#allocation5 + $0xb08] sm:$0xff]  ;;  %v699_v4 = vld [vmem:[#allocation5 + $0xb00] sm:$0xff]  ;;  %v701_v5 = vld [vmem:[#allocation5 + $0xb10] sm:$0xff] }
  0xb5   : > { %2251 = vmatprep.subr.bf16.mxu0 %v2250_v39  ;;  %947 = vmatprep.mubr.f32.mxu1 %v252_v49  ;;  %v2266_v39 = vpack.c.bf16 %v694_v28, %v692_v27  ;;  %v316_v49 = vld [vmem:[%s2999_s30 + $0x308] sm:$0xff]  ;;  %v450_v9 = vld [vmem:[#allocation5 + $0x338] sm:$0xff]  ;;  %v447_v15 = vld [vmem:[#allocation5 + $0x320] sm:$0xff] }
  0xb6   : > { %1399 = vmatprep.mubr.f32.mxu0 %v260_v54  ;;  %948 = vmatmul.mubr.f32.gmra.mrb[4].mxu1 %v251_v58  ;;  %v324_v54 = vld [vmem:[%s2999_s30 + $0x348] sm:$0xff]  ;;  %v315_v58 = vld [vmem:[%s2999_s30 + $0x300] sm:$0xff]  ;;  %v706_v12 = vld [vmem:[#allocation5 + $0xb38] sm:$0xff] }
  0xb7   : > { %1997 = vmatpush1.bf16.msra.mxu1 %v1996_v46  ;;  %1400 = vmatmul.mubr.f32.gmra.mrb[4].mxu0 %v259_v61  ;;  %v2012_v46 = vpack.c.bf16 %v437_v32, %v435_v31  ;;  %v323_v61 = vld [vmem:[%s2999_s30 + $0x340] sm:$0xff]  ;;  %v448_v8 = vld [vmem:[#allocation5 + $0x328] sm:$0xff]  ;;  %v222_v16 = vld [vmem:[%s2999_s30 + $0x18] sm:$0xff] }
  0xb8   : > { %2253 = vmatpush1.bf16.msra.mxu0 %v2252_v50  ;;  %1999 = vmatprep.subr.bf16.mxu1 %v1998_v51  ;;  %v2268_v50 = vpack.c.bf16 %v693_v37, %v691_v36  ;;  %v2014_v51 = vpack.c.bf16 %v442_v41, %v440_v40  ;;  %v704_v11 = vld [vmem:[#allocation5 + $0xb28] sm:$0xff]  ;;  %v703_v20 = vld [vmem:[#allocation5 + $0xb20] sm:$0xff]  ;;  %v230_v21 = vld [vmem:[%s2999_s30 + $0x58] sm:$0xff] }
  0xb9   : > { %2255 = vmatprep.subr.bf16.mxu0 %v2254_v55  ;;  %953 = vmatprep.mubr.f32.mxu1 %v268_v1  ;;  %v2270_v55 = vpack.c.bf16 %v698_v44, %v696_v43  ;;  %v332_v1 = vld [vmem:[%s2999_s30 + $0x388] sm:$0xff]  ;;  %v454_v25 = vld [vmem:[#allocation5 + $0x358] sm:$0xff]  ;;  %v451_v31 = vld [vmem:[#allocation5 + $0x340] sm:$0xff] }
  0xba   : > { %1405 = vmatprep.mubr.f32.mxu0 %v276_v6  ;;  %954 = vmatmul.mubr.f32.gmra.mrb[6].mxu1 %v267_v10  ;;  %v340_v6 = vld [vmem:[%s2999_s30 + $0x3c8] sm:$0xff]  ;;  %v331_v10 = vld [vmem:[%s2999_s30 + $0x380] sm:$0xff]  ;;  %v710_v27 = vld [vmem:[#allocation5 + $0xb58] sm:$0xff] }
  0xbb   : > { %2001 = vmatpush1.bf16.msra.mxu1 %v2000_v62  ;;  %1406 = vmatmul.mubr.f32.gmra.mrb[6].mxu0 %v275_v13  ;;  %v2016_v62 = vpack.c.bf16 %v441_v48, %v439_v47  ;;  %v339_v13 = vld [vmem:[%s2999_s30 + $0x3c0] sm:$0xff]  ;;  %v452_v24 = vld [vmem:[#allocation5 + $0x348] sm:$0xff]  ;;  %v453_v32 = vld [vmem:[#allocation5 + $0x350] sm:$0xff] }
  0xbc   : > { %2257 = vmatpush1.bf16.msra.mxu0 %v2256_v2  ;;  %2003 = vmatprep.subr.bf16.mxu1 %v2002_v3  ;;  %v2272_v2 = vpack.c.bf16 %v697_v53, %v695_v52  ;;  %v2018_v3 = vpack.c.bf16 %v446_v57, %v444_v56  ;;  %v456_v36 = vld [vmem:[#allocation5 + $0x368] sm:$0xff]  ;;  %v458_v37 = vld [vmem:[#allocation5 + $0x378] sm:$0xff]  ;;  %v2028_v40 = vpack.c.bf16 %v453_v32, %v451_v31  ;;  %v455_v43 = vld [vmem:[#allocation5 + $0x360] sm:$0xff] }
  0xbd   : > { %2259 = vmatprep.subr.bf16.mxu0 %v2258_v7  ;;  %959 = vmatprep.mubr.f32.mxu1 %v284_v17  ;;  %v2274_v7 = vpack.c.bf16 %v702_v60, %v700_v59  ;;  %v2276_v17 = vpack.c.bf16 %v701_v5, %v699_v4  ;;  %v457_v44 = vld [vmem:[#allocation5 + $0x370] sm:$0xff]  ;;  %v460_v48 = vld [vmem:[#allocation5 + $0x388] sm:$0xff]  ;;  %v715_v57 = vld [vmem:[#allocation5 + $0xb80] sm:$0xff] }
  0xbe   : > { %1411 = vmatprep.mubr.f32.mxu0 %v292_v22  ;;  %960 = vmatmul.mubr.f32.gmra.mrb[8].mxu1 %v283_v26  ;;  %v2278_v22 = vpack.c.bf16 %v706_v12, %v704_v11  ;;  %v708_v26 = vld [vmem:[#allocation5 + $0xb48] sm:$0xff]  ;;  %v713_v47 = vld [vmem:[#allocation5 + $0xb70] sm:$0xff]  ;;  %v2032_v52 = vpack.c.bf16 %v457_v44, %v455_v43  ;;  %v719_v5 = vld [vmem:[#allocation5 + $0xba0] sm:$0xff] }
  0xbf   : > { %2005 = vmatpush1.bf16.msra.mxu1 %v2004_v14  ;;  %1412 = vmatmul.mubr.f32.gmra.mrb[8].mxu0 %v291_v29  ;;  %v2020_v14 = vpack.c.bf16 %v445_v0, %v443_v63  ;;  %v461_v56 = vld [vmem:[#allocation5 + $0x390] sm:$0xff]  ;;  %v464_v60 = vld [vmem:[#allocation5 + $0x3a8] sm:$0xff]  ;;  %v722_v63 = vld [vmem:[#allocation5 + $0xbb8] sm:$0xff] }
  0xc0   : > { %2261 = vmatpush1.bf16.msra.mxu0 %v2260_v18  ;;  %2007 = vmatprep.subr.bf16.mxu1 %v2006_v19  ;;  %v2022_v18 = vpack.c.bf16 %v450_v9, %v448_v8  ;;  %v449_v19 = vld [vmem:[#allocation5 + $0x330] sm:$0xff]  ;;  %v468_v8 = vld [vmem:[#allocation5 + $0x3c8] sm:$0xff]  ;;  %v470_v9 = vld [vmem:[#allocation5 + $0x3d8] sm:$0xff] }
  0xc1   : > { %2263 = vmatprep.subr.bf16.mxu0 %v2262_v23  ;;  %965 = vmatprep.mubr.f32.mxu1 %v300_v33  ;;  %v705_v23 = vld [vmem:[#allocation5 + $0xb30] sm:$0xff]  ;;  %v2024_v28 = vpack.c.bf16 %v449_v19, %v447_v15  ;;  %v707_v33 = vld [vmem:[#allocation5 + $0xb40] sm:$0xff]  ;;  %v726_v11 = vld [vmem:[#allocation5 + $0xbd8] sm:$0xff] }
  0xc2   : > { %1417 = vmatprep.mubr.f32.mxu0 %v308_v38  ;;  %966 = vmatmul.mubr.f32.gmra.mrb[10].mxu1 %v299_v42  ;;  %v2280_v29 = vpack.c.bf16 %v705_v23, %v703_v20  ;;  %v712_v38 = vld [vmem:[#allocation5 + $0xb68] sm:$0xff]  ;;  %v2030_v42 = vpack.c.bf16 %v458_v37, %v456_v36  ;;  %v717_v59 = vld [vmem:[#allocation5 + $0xb90] sm:$0xff]  ;;  %v467_v15 = vld [vmem:[#allocation5 + $0x3c0] sm:$0xff] }
  0xc3   : > { %2009 = vmatpush1.bf16.msra.mxu1 %v2008_v30  ;;  %1418 = vmatmul.mubr.f32.gmra.mrb[10].mxu0 %v307_v45  ;;  %v2026_v30 = vpack.c.bf16 %v454_v25, %v452_v24  ;;  %v711_v45 = vld [vmem:[#allocation5 + $0xb60] sm:$0xff]  ;;  %v465_v4 = vld [vmem:[#allocation5 + $0x3b0] sm:$0xff]  ;;  %v472_v20 = vld [vmem:[#allocation5 + $0x3e8] sm:$0xff] }
  0xc4   : > { %2265 = vmatpush1.bf16.msra.mxu0 %v2264_v34  ;;  %2011 = vmatprep.subr.bf16.mxu1 %v2010_v35  ;;  %v2282_v34 = vpack.c.bf16 %v710_v27, %v708_v26  ;;  %v709_v35 = vld [vmem:[#allocation5 + $0xb50] sm:$0xff]  ;;  %v2288_v53 = vpack.c.bf16 %v713_v47, %v711_v45  ;;  %v730_v23 = vld [vmem:[#allocation5 + $0xbf8] sm:$0xff]  ;;  %v471_v27 = vld [vmem:[#allocation5 + $0x3e0] sm:$0xff] }
  0xc5   : > { %2267 = vmatprep.subr.bf16.mxu0 %v2266_v39  ;;  %971 = vmatprep.mubr.f32.mxu1 %v316_v49  ;;  %v714_v39 = vld [vmem:[#allocation5 + $0xb78] sm:$0xff]  ;;  %v2284_v41 = vpack.c.bf16 %v709_v35, %v707_v33  ;;  %v725_v19 = vld [vmem:[#allocation5 + $0xbd0] sm:$0xff]  ;;  %v476_v32 = vld [vmem:[#allocation5 + $0x408] sm:$0xff] }
  0xc6   : > { %1423 = vmatprep.mubr.f32.mxu0 %v324_v54  ;;  %972 = vmatmul.mubr.f32.gmra.mrb[12].mxu1 %v315_v58  ;;  %v462_v49 = vld [vmem:[#allocation5 + $0x398] sm:$0xff]  ;;  %v729_v31 = vld [vmem:[#allocation5 + $0xbf0] sm:$0xff]  ;;  %v480_v44 = vld [vmem:[#allocation5 + $0x428] sm:$0xff] }
  0xc7   : > { %2013 = vmatpush1.bf16.msra.mxu1 %v2012_v46  ;;  %1424 = vmatmul.mubr.f32.gmra.mrb[12].mxu0 %v323_v61  ;;  %v2286_v46 = vpack.c.bf16 %v714_v39, %v712_v38  ;;  %v2034_v54 = vpack.c.bf16 %v462_v49, %v460_v48  ;;  %v466_v61 = vld [vmem:[#allocation5 + $0x3b8] sm:$0xff]  ;;  %v475_v39 = vld [vmem:[#allocation5 + $0x400] sm:$0xff]  ;;  %v733_v43 = vld [vmem:[#allocation5 + $0xc10] sm:$0xff] }
  0xc8   : > { %2269 = vmatpush1.bf16.msra.mxu0 %v2268_v50  ;;  %2015 = vmatprep.subr.bf16.mxu1 %v2014_v51  ;;  %v716_v50 = vld [vmem:[#allocation5 + $0xb88] sm:$0xff]  ;;  %v718_v51 = vld [vmem:[#allocation5 + $0xb98] sm:$0xff]  ;;  %v221_v48 = vld [vmem:[%s2999_s30 + $0x10] sm:$0xff] }
  0xc9   : > { %2271 = vmatprep.subr.bf16.mxu0 %v2270_v55  ;;  %977 = vmatprep.mubr.f32.mxu1 %v332_v1  ;;  %v459_v55 = vld [vmem:[#allocation5 + $0x380] sm:$0xff]  ;;  %v2290_v58 = vpack.c.bf16 %v718_v51, %v716_v50  ;;  %v2292_v1 = vpack.c.bf16 %v717_v59, %v715_v57  ;;  %v478_v33 = vld [vmem:[#allocation5 + $0x418] sm:$0xff]  ;;  %v229_v50 = vld [vmem:[%s2999_s30 + $0x50] sm:$0xff] }
  0xca   : > { %1429 = vmatprep.mubr.f32.mxu0 %v340_v6  ;;  %978 = vmatmul.mubr.f32.gmra.mrb[14].mxu1 %v331_v10  ;;  %v2036_v0 = vpack.c.bf16 %v461_v56, %v459_v55  ;;  %v724_v10 = vld [vmem:[#allocation5 + $0xbc8] sm:$0xff]  ;;  %v734_v35 = vld [vmem:[#allocation5 + $0xc18] sm:$0xff]  ;;  %v2050_v38 = vpack.c.bf16 %v478_v33, %v476_v32  ;;  %v735_v55 = vld [vmem:[#allocation5 + $0xc20] sm:$0xff] }
  0xcb   : > { %2017 = vmatpush1.bf16.msra.mxu1 %v2016_v62  ;;  %1430 = vmatmul.mubr.f32.gmra.mrb[14].mxu0 %v339_v13  ;;  %v720_v62 = vld [vmem:[#allocation5 + $0xba8] sm:$0xff]  ;;  %v482_v45 = vld [vmem:[#allocation5 + $0x438] sm:$0xff]  ;;  %v737_v57 = vld [vmem:[#allocation5 + $0xc30] sm:$0xff] }
  0xcc   : > { %2273 = vmatpush1.bf16.msra.mxu0 %v2272_v2  ;;  %2019 = vmatprep.subr.bf16.mxu1 %v2018_v3  ;;  %v2038_v2 = vpack.c.bf16 %v466_v61, %v464_v60  ;;  %v463_v3 = vld [vmem:[#allocation5 + $0x3a0] sm:$0xff]  ;;  %v2294_v6 = vpack.c.bf16 %v722_v63, %v720_v62  ;;  %v738_v47 = vld [vmem:[#allocation5 + $0xc38] sm:$0xff]  ;;  %v740_v60 = vld [vmem:[#allocation5 + $0xc48] sm:$0xff] }
  0xcd   : > { %2275 = vmatprep.subr.bf16.mxu0 %v2274_v7  ;;  %1048 = vmatprep.mubr.f32.mxu1 %v222_v16  ;;  %v721_v7 = vld [vmem:[#allocation5 + $0xbb0] sm:$0xff]  ;;  %v2040_v12 = vpack.c.bf16 %v465_v4, %v463_v3  ;;  %v486_v59 = vld [vmem:[#allocation5 + $0x458] sm:$0xff]  ;;  %v2312_v3 = vpack.c.bf16 %v737_v57, %v735_v55  ;;  %v491_v32 = vld [vmem:[#allocation5 + $0x480] sm:$0xff] }
  0xce   : > { %1500 = vmatprep.mubr.f32.mxu0 %v230_v21  ;;  %v2296_v13 = vpack.c.bf16 %v721_v7, %v719_v5  ;;  %v469_v16 = vld [vmem:[#allocation5 + $0x3d0] sm:$0xff]  ;;  %v474_v21 = vld [vmem:[#allocation5 + $0x3f8] sm:$0xff] }
  0xcf   : > { %2021 = vmatpush1.bf16.msra.mxu1 %v2020_v14  ;;  %v2042_v14 = vpack.c.bf16 %v470_v9, %v468_v8  ;;  %v2044_v24 = vpack.c.bf16 %v469_v16, %v467_v15  ;;  %v2046_v26 = vpack.c.bf16 %v474_v21, %v472_v20  ;;  %v742_v61 = vld [vmem:[#allocation5 + $0xc58] sm:$0xff]  ;;  %v485_v5 = vld [vmem:[#allocation5 + $0x450] sm:$0xff]  ;;  %v487_v16 = vld [vmem:[#allocation5 + $0x460] sm:$0xff] }
  0xd0   : > { %2277 = vmatpush1.bf16.msra.mxu0 %v2276_v17  ;;  %2023 = vmatprep.subr.bf16.mxu1 %v2022_v18  ;;  %v723_v17 = vld [vmem:[#allocation5 + $0xbc0] sm:$0xff]  ;;  %v2298_v18 = vpack.c.bf16 %v726_v11, %v724_v10  ;;  %v238_v62 = vld [vmem:[%s2999_s30 + $0x98] sm:$0xff]  ;;  %v245_v7 = vld [vmem:[%s2999_s30 + $0xd0] sm:$0xff]  ;;  %v2314_v8 = vpack.c.bf16 %v742_v61, %v740_v60 }
  0xd1   : > { %2279 = vmatprep.subr.bf16.mxu0 %v2278_v22  ;;  %v728_v22 = vld [vmem:[#allocation5 + $0xbe8] sm:$0xff]  ;;  %v2300_v25 = vpack.c.bf16 %v725_v19, %v723_v17  ;;  %v741_v9 = vld [vmem:[#allocation5 + $0xc50] sm:$0xff]  ;;  %v490_v11 = vld [vmem:[#allocation5 + $0x478] sm:$0xff] }
  0xd2   : > { %v488_v10 = vld [vmem:[#allocation5 + $0x468] sm:$0xff]  ;;  %v262_v17 = vld [vmem:[%s2999_s30 + $0x158] sm:$0xff]  ;;  %v489_v21 = vld [vmem:[#allocation5 + $0x470] sm:$0xff] }
  0xd3   : > { %2025 = vmatpush1.bf16.msra.mxu1 %v2024_v28  ;;  %v473_v28 = vld [vmem:[#allocation5 + $0x3f0] sm:$0xff]  ;;  %v2062_v20 = vpack.c.bf16 %v490_v11, %v488_v10  ;;  %v278_v33 = vld [vmem:[%s2999_s30 + $0x1d8] sm:$0xff]  ;;  %v756_v60 = vld [vmem:[#allocation5 + $0xcc8] sm:$0xff] }
  0xd4   : > { %2281 = vmatpush1.bf16.msra.mxu0 %v2280_v29  ;;  %2027 = vmatprep.subr.bf16.mxu1 %v2026_v30  ;;  %v727_v29 = vld [vmem:[#allocation5 + $0xbe0] sm:$0xff]  ;;  %v2302_v30 = vpack.c.bf16 %v730_v23, %v728_v22  ;;  %v2048_v36 = vpack.c.bf16 %v473_v28, %v471_v27  ;;  %v261_v23 = vld [vmem:[%s2999_s30 + $0x150] sm:$0xff]  ;;  %v494_v27 = vld [vmem:[#allocation5 + $0x498] sm:$0xff] }
  0xd5   : > { %2283 = vmatprep.subr.bf16.mxu0 %v2282_v34  ;;  %v732_v34 = vld [vmem:[#allocation5 + $0xc08] sm:$0xff]  ;;  %v2304_v37 = vpack.c.bf16 %v729_v31, %v727_v29  ;;  %v743_v22 = vld [vmem:[#allocation5 + $0xc60] sm:$0xff]  ;;  %v750_v29 = vld [vmem:[#allocation5 + $0xc98] sm:$0xff]  ;;  %v2064_v31 = vpack.c.bf16 %v489_v21, %v487_v16 }
  0xd6   : > { %v748_v28 = vld [vmem:[#allocation5 + $0xc88] sm:$0xff]  ;;  %v293_v55 = vld [vmem:[%s2999_s30 + $0x250] sm:$0xff]  ;;  %v758_v61 = vld [vmem:[#allocation5 + $0xcd8] sm:$0xff] }
  0xd7   : > { %2029 = vmatpush1.bf16.msra.mxu1 %v2028_v40  ;;  %v477_v40 = vld [vmem:[#allocation5 + $0x410] sm:$0xff]  ;;  %v504_v10 = vld [vmem:[#allocation5 + $0x4e8] sm:$0xff]  ;;  %v506_v11 = vld [vmem:[#allocation5 + $0x4f8] sm:$0xff] }
  0xd8   : > { %2285 = vmatpush1.bf16.msra.mxu0 %v2284_v41  ;;  %2031 = vmatprep.subr.bf16.mxu1 %v2030_v42  ;;  %v731_v41 = vld [vmem:[#allocation5 + $0xc00] sm:$0xff]  ;;  %v2306_v42 = vpack.c.bf16 %v734_v35, %v732_v34  ;;  %v2052_v49 = vpack.c.bf16 %v477_v40, %v475_v39  ;;  %v269_v34 = vld [vmem:[%s2999_s30 + $0x190] sm:$0xff]  ;;  %v2322_v40 = vpack.c.bf16 %v750_v29, %v748_v28  ;;  %v764_v28 = vld [vmem:[#allocation5 + $0xd08] sm:$0xff] }
  0xd9   : > { %2287 = vmatprep.subr.bf16.mxu0 %v2286_v46  ;;  %v736_v46 = vld [vmem:[#allocation5 + $0xc28] sm:$0xff]  ;;  %v2308_v51 = vpack.c.bf16 %v733_v43, %v731_v41  ;;  %v277_v39 = vld [vmem:[%s2999_s30 + $0x1d0] sm:$0xff]  ;;  %v498_v43 = vld [vmem:[#allocation5 + $0x4b8] sm:$0xff] }
  0xda   : > { %v2310_v56 = vpack.c.bf16 %v738_v47, %v736_v46  ;;  %v749_v41 = vld [vmem:[#allocation5 + $0xc90] sm:$0xff]  ;;  %v286_v46 = vld [vmem:[%s2999_s30 + $0x218] sm:$0xff]  ;;  %v503_v16 = vld [vmem:[#allocation5 + $0x4e0] sm:$0xff] }
  0xdb   : > { %2033 = vmatpush1.bf16.msra.mxu1 %v2032_v52  ;;  %v2054_v52 = vpack.c.bf16 %v482_v45, %v480_v44  ;;  %v752_v44 = vld [vmem:[#allocation5 + $0xca8] sm:$0xff]  ;;  %v754_v45 = vld [vmem:[#allocation5 + $0xcb8] sm:$0xff]  ;;  %v753_v57 = vld [vmem:[#allocation5 + $0xcb0] sm:$0xff] }
  0xdc   : > { %2289 = vmatpush1.bf16.msra.mxu0 %v2288_v53  ;;  %2035 = vmatprep.subr.bf16.mxu1 %v2034_v54  ;;  %v479_v53 = vld [vmem:[#allocation5 + $0x420] sm:$0xff]  ;;  %v481_v54 = vld [vmem:[#allocation5 + $0x430] sm:$0xff]  ;;  %v766_v29 = vld [vmem:[#allocation5 + $0xd18] sm:$0xff] }
  0xdd   : > { %2291 = vmatprep.subr.bf16.mxu0 %v2290_v58  ;;  %v484_v58 = vld [vmem:[#allocation5 + $0x448] sm:$0xff]  ;;  %v2056_v63 = vpack.c.bf16 %v481_v54, %v479_v53  ;;  %v497_v53 = vld [vmem:[#allocation5 + $0x4b0] sm:$0xff]  ;;  %v751_v54 = vld [vmem:[#allocation5 + $0xca0] sm:$0xff] }
  0xde   : > { %v2058_v4 = vpack.c.bf16 %v486_v59, %v484_v58  ;;  %v500_v58 = vld [vmem:[#allocation5 + $0x4c8] sm:$0xff]  ;;  %v502_v59 = vld [vmem:[#allocation5 + $0x4d8] sm:$0xff]  ;;  %v505_v21 = vld [vmem:[#allocation5 + $0x4f0] sm:$0xff] }
  0xdf   : > { %2037 = vmatpush1.bf16.msra.mxu1 %v2036_v0  ;;  %v483_v0 = vld [vmem:[#allocation5 + $0x440] sm:$0xff] }
  0xe0   : > { %2293 = vmatpush1.bf16.msra.mxu0 %v2292_v1  ;;  %2039 = vmatprep.subr.bf16.mxu1 %v2038_v2  ;;  %v246_v1 = vld [vmem:[%s2999_s30 + $0xd8] sm:$0xff]  ;;  %v237_v2 = vld [vmem:[%s2999_s30 + $0x90] sm:$0xff]  ;;  %v2060_v15 = vpack.c.bf16 %v485_v5, %v483_v0  ;;  %v499_v0 = vld [vmem:[#allocation5 + $0x4c0] sm:$0xff] }
  0xe1   : > { %2295 = vmatprep.subr.bf16.mxu0 %v2294_v6  ;;  %v739_v6 = vld [vmem:[#allocation5 + $0xc40] sm:$0xff]  ;;  %v501_v5 = vld [vmem:[#allocation5 + $0x4d0] sm:$0xff] }
  0xe2   : > { %v2316_v19 = vpack.c.bf16 %v741_v9, %v739_v6  ;;  %v755_v6 = vld [vmem:[#allocation5 + $0xcc0] sm:$0xff]  ;;  %v757_v9 = vld [vmem:[#allocation5 + $0xcd0] sm:$0xff] }
  0xe3   : > { %2041 = vmatpush1.bf16.msra.mxu1 %v2040_v12  ;;  %v744_v12 = vld [vmem:[#allocation5 + $0xc68] sm:$0xff] }
  0xe4   : > { %2297 = vmatpush1.bf16.msra.mxu0 %v2296_v13  ;;  %2043 = vmatprep.subr.bf16.mxu1 %v2042_v14  ;;  %v746_v13 = vld [vmem:[#allocation5 + $0xc78] sm:$0xff] }
  0xe5   : > { %2299 = vmatprep.subr.bf16.mxu0 %v2298_v18  ;;  %v254_v14 = vld [vmem:[%s2999_s30 + $0x118] sm:$0xff]  ;;  %v253_v18 = vld [vmem:[%s2999_s30 + $0x110] sm:$0xff] }
  0xe7   : > { %2045 = vmatpush1.bf16.msra.mxu1 %v2044_v24  ;;  %v2318_v24 = vpack.c.bf16 %v746_v13, %v744_v12  ;;  %v760_v12 = vld [vmem:[#allocation5 + $0xce8] sm:$0xff]  ;;  %v762_v13 = vld [vmem:[#allocation5 + $0xcf8] sm:$0xff] }
  0xe8   : > { %2301 = vmatpush1.bf16.msra.mxu0 %v2300_v25  ;;  %2047 = vmatprep.subr.bf16.mxu1 %v2046_v26  ;;  %v745_v25 = vld [vmem:[#allocation5 + $0xc70] sm:$0xff]  ;;  %v492_v26 = vld [vmem:[#allocation5 + $0x488] sm:$0xff] }
  0xe9   : > { %2303 = vmatprep.subr.bf16.mxu0 %v2302_v30  ;;  %v270_v30 = vld [vmem:[%s2999_s30 + $0x198] sm:$0xff]  ;;  %v2320_v35 = vpack.c.bf16 %v745_v25, %v743_v22  ;;  %v759_v22 = vld [vmem:[#allocation5 + $0xce0] sm:$0xff]  ;;  %v761_v25 = vld [vmem:[#allocation5 + $0xcf0] sm:$0xff] }
  0xeb   : > { %2049 = vmatpush1.bf16.msra.mxu1 %v2048_v36  ;;  %v2066_v36 = vpack.c.bf16 %v494_v27, %v492_v26  ;;  %v508_v26 = vld [vmem:[#allocation5 + $0x508] sm:$0xff]  ;;  %v510_v27 = vld [vmem:[#allocation5 + $0x518] sm:$0xff] }
  0xec   : > { %2305 = vmatpush1.bf16.msra.mxu0 %v2304_v37  ;;  %2051 = vmatprep.subr.bf16.mxu1 %v2050_v38  ;;  %v493_v37 = vld [vmem:[#allocation5 + $0x490] sm:$0xff]  ;;  %v747_v38 = vld [vmem:[#allocation5 + $0xc80] sm:$0xff] }
  0xed   : > { %2307 = vmatprep.subr.bf16.mxu0 %v2306_v42  ;;  %v496_v42 = vld [vmem:[#allocation5 + $0x4a8] sm:$0xff]  ;;  %v2068_v47 = vpack.c.bf16 %v493_v37, %v491_v32  ;;  %v507_v32 = vld [vmem:[#allocation5 + $0x500] sm:$0xff]  ;;  %v509_v37 = vld [vmem:[#allocation5 + $0x510] sm:$0xff] }
  0xee   : > { %1049 = vmatmul.mubr.f32.vlgmr.msra.gmra.mrb[0].mxu1 %v221_v48  ;;  %v495_v48 = vld [vmem:[#allocation5 + $0x4a0] sm:$0xff] }
  0xef   : > { %2053 = vmatpush1.bf16.msra.mxu1 %v2052_v49  ;;  %1501 = vmatmul.mubr.f32.vlgmr.msra.gmra.mrb[0].mxu0 %v229_v50  ;;  %v294_v49 = vld [vmem:[%s2999_s30 + $0x258] sm:$0xff]  ;;  %v285_v50 = vld [vmem:[%s2999_s30 + $0x210] sm:$0xff] }
  0xf0   : > { %2309 = vmatpush1.bf16.msra.mxu0 %v2308_v51  ;;  %2055 = vmatprep.subr.bf16.mxu1 %v2054_v52  ;;  %v2324_v51 = vpack.c.bf16 %v749_v41, %v747_v38  ;;  %v2070_v52 = vpack.c.bf16 %v498_v43, %v496_v42  ;;  %v763_v38 = vld [vmem:[#allocation5 + $0xd00] sm:$0xff]  ;;  %v765_v41 = vld [vmem:[#allocation5 + $0xd10] sm:$0xff]  ;;  %v512_v42 = vld [vmem:[#allocation5 + $0x528] sm:$0xff] }
  0xf1   : > { %2311 = vmatprep.subr.bf16.mxu0 %v2310_v56  ;;  %1054 = vmatprep.mubr.f32.mxu1 %v238_v62  ;;  %v2326_v56 = vpack.c.bf16 %v754_v45, %v752_v44  ;;  %v302_v62 = vld [vmem:[%s2999_s30 + $0x298] sm:$0xff]  ;;  %v768_v44 = vld [vmem:[#allocation5 + $0xd28] sm:$0xff] }
  0xf2   : > { %1506 = vmatprep.mubr.f32.mxu0 %v246_v1  ;;  %1055 = vmatmul.mubr.f32.gmra.mrb[2].mxu1 %v237_v2  ;;  %v310_v1 = vld [vmem:[%s2999_s30 + $0x2d8] sm:$0xff]  ;;  %v301_v2 = vld [vmem:[%s2999_s30 + $0x290] sm:$0xff] }
  0xf3   : > { %2057 = vmatpush1.bf16.msra.mxu1 %v2056_v63  ;;  %1507 = vmatmul.mubr.f32.gmra.mrb[2].mxu0 %v245_v7  ;;  %v2072_v63 = vpack.c.bf16 %v497_v53, %v495_v48  ;;  %v309_v7 = vld [vmem:[%s2999_s30 + $0x2d0] sm:$0xff]  ;;  %v514_v43 = vld [vmem:[#allocation5 + $0x538] sm:$0xff]  ;;  %v232_v48 = vld [vmem:[%s2999_s30 + $0x68] sm:$0xff] }
  0xf4   : > { %2313 = vmatpush1.bf16.msra.mxu0 %v2312_v3  ;;  %2059 = vmatprep.subr.bf16.mxu1 %v2058_v4  ;;  %v2328_v3 = vpack.c.bf16 %v753_v57, %v751_v54  ;;  %v2074_v4 = vpack.c.bf16 %v502_v59, %v500_v58  ;;  %v770_v45 = vld [vmem:[#allocation5 + $0xd38] sm:$0xff]  ;;  %v767_v53 = vld [vmem:[#allocation5 + $0xd20] sm:$0xff]  ;;  %v772_v58 = vld [vmem:[#allocation5 + $0xd48] sm:$0xff] }
  0xf5   : > { %2315 = vmatprep.subr.bf16.mxu0 %v2314_v8  ;;  %1060 = vmatprep.mubr.f32.mxu1 %v254_v14  ;;  %v2330_v8 = vpack.c.bf16 %v758_v61, %v756_v60  ;;  %v318_v14 = vld [vmem:[%s2999_s30 + $0x318] sm:$0xff]  ;;  %v2342_v54 = vpack.c.bf16 %v770_v45, %v768_v44 }
  0xf6   : > { %1512 = vmatprep.mubr.f32.mxu0 %v262_v17  ;;  %1061 = vmatmul.mubr.f32.gmra.mrb[4].mxu1 %v253_v18  ;;  %v326_v17 = vld [vmem:[%s2999_s30 + $0x358] sm:$0xff]  ;;  %v317_v18 = vld [vmem:[%s2999_s30 + $0x310] sm:$0xff] }
  0xf7   : > { %2061 = vmatpush1.bf16.msra.mxu1 %v2060_v15  ;;  %1513 = vmatmul.mubr.f32.gmra.mrb[4].mxu0 %v261_v23  ;;  %v2076_v15 = vpack.c.bf16 %v501_v5, %v499_v0  ;;  %v325_v23 = vld [vmem:[%s2999_s30 + $0x350] sm:$0xff]  ;;  %v518_v57 = vld [vmem:[#allocation5 + $0x558] sm:$0xff] }
  0xf8   : > { %2317 = vmatpush1.bf16.msra.mxu0 %v2316_v19  ;;  %2063 = vmatprep.subr.bf16.mxu1 %v2062_v20  ;;  %v2332_v19 = vpack.c.bf16 %v757_v9, %v755_v6  ;;  %v2078_v20 = vpack.c.bf16 %v506_v11, %v504_v10  ;;  %v774_v59 = vld [vmem:[#allocation5 + $0xd58] sm:$0xff]  ;;  %v517_v0 = vld [vmem:[#allocation5 + $0x550] sm:$0xff]  ;;  %v776_v6 = vld [vmem:[#allocation5 + $0xd68] sm:$0xff] }
  0xf9   : > { %2319 = vmatprep.subr.bf16.mxu0 %v2318_v24  ;;  %1066 = vmatprep.mubr.f32.mxu1 %v270_v30  ;;  %v2334_v24 = vpack.c.bf16 %v762_v13, %v760_v12  ;;  %v334_v30 = vld [vmem:[%s2999_s30 + $0x398] sm:$0xff]  ;;  %v519_v11 = vld [vmem:[#allocation5 + $0x560] sm:$0xff]  ;;  %v521_v12 = vld [vmem:[#allocation5 + $0x570] sm:$0xff] }
  0xfa   : > { %1518 = vmatprep.mubr.f32.mxu0 %v278_v33  ;;  %1067 = vmatmul.mubr.f32.gmra.mrb[6].mxu1 %v269_v34  ;;  %v342_v33 = vld [vmem:[%s2999_s30 + $0x3d8] sm:$0xff]  ;;  %v333_v34 = vld [vmem:[%s2999_s30 + $0x390] sm:$0xff]  ;;  %v775_v13 = vld [vmem:[#allocation5 + $0xd60] sm:$0xff] }
  0xfb   : > { %2065 = vmatpush1.bf16.msra.mxu1 %v2064_v31  ;;  %1519 = vmatmul.mubr.f32.gmra.mrb[6].mxu0 %v277_v39  ;;  %v2080_v31 = vpack.c.bf16 %v505_v21, %v503_v16  ;;  %v341_v39 = vld [vmem:[%s2999_s30 + $0x3d0] sm:$0xff]  ;;  %v522_v5 = vld [vmem:[#allocation5 + $0x578] sm:$0xff]  ;;  %v524_v16 = vld [vmem:[#allocation5 + $0x588] sm:$0xff] }
  0xfc   : > { %2321 = vmatpush1.bf16.msra.mxu0 %v2320_v35  ;;  %2067 = vmatprep.subr.bf16.mxu1 %v2066_v36  ;;  %v2336_v35 = vpack.c.bf16 %v761_v25, %v759_v22  ;;  %v2082_v36 = vpack.c.bf16 %v510_v27, %v508_v26  ;;  %v779_v25 = vld [vmem:[#allocation5 + $0xd80] sm:$0xff]  ;;  %v781_v27 = vld [vmem:[#allocation5 + $0xd90] sm:$0xff] }
  0xfd   : > { %2323 = vmatprep.subr.bf16.mxu0 %v2322_v40  ;;  %1072 = vmatprep.mubr.f32.mxu1 %v286_v46  ;;  %v2338_v40 = vpack.c.bf16 %v766_v29, %v764_v28  ;;  %v224_v46 = vld [vmem:[%s2999_s30 + $0x28] sm:$0xff]  ;;  %v530_v29 = vld [vmem:[#allocation5 + $0x5b8] sm:$0xff] }
  0xfe   : > { %1524 = vmatprep.mubr.f32.mxu0 %v294_v49  ;;  %1073 = vmatmul.mubr.f32.gmra.mrb[8].mxu1 %v285_v50  ;;  %v2340_v49 = vpack.c.bf16 %v765_v41, %v763_v38  ;;  %v2086_v50 = vpack.c.bf16 %v514_v43, %v512_v42  ;;  %v528_v28 = vld [vmem:[#allocation5 + $0x5a8] sm:$0xff]  ;;  %v534_v41 = vld [vmem:[#allocation5 + $0x5d8] sm:$0xff] }
  0xff   : > { %2069 = vmatpush1.bf16.msra.mxu1 %v2068_v47  ;;  %1525 = vmatmul.mubr.f32.gmra.mrb[8].mxu0 %v293_v55  ;;  %v2084_v47 = vpack.c.bf16 %v509_v37, %v507_v32  ;;  %v769_v55 = vld [vmem:[#allocation5 + $0xd30] sm:$0xff]  ;;  %v783_v37 = vld [vmem:[#allocation5 + $0xda0] sm:$0xff]  ;;  %v788_v42 = vld [vmem:[#allocation5 + $0xdc8] sm:$0xff] }
 0x100   : > { %2325 = vmatpush1.bf16.msra.mxu0 %v2324_v51  ;;  %2071 = vmatprep.subr.bf16.mxu1 %v2070_v52  ;;  %v511_v51 = vld [vmem:[#allocation5 + $0x520] sm:$0xff]  ;;  %v513_v52 = vld [vmem:[#allocation5 + $0x530] sm:$0xff]  ;;  %v2344_v61 = vpack.c.bf16 %v769_v55, %v767_v53  ;;  %v790_v43 = vld [vmem:[#allocation5 + $0xdd8] sm:$0xff] }
 0x101   : > { %2327 = vmatprep.subr.bf16.mxu0 %v2326_v56  ;;  %1078 = vmatprep.mubr.f32.mxu1 %v302_v62  ;;  %v516_v56 = vld [vmem:[#allocation5 + $0x548] sm:$0xff]  ;;  %v2088_v60 = vpack.c.bf16 %v513_v52, %v511_v51  ;;  %v789_v51 = vld [vmem:[#allocation5 + $0xdd0] sm:$0xff]  ;;  %v538_v53 = vld [vmem:[#allocation5 + $0x5f8] sm:$0xff] }
 0x102   : > { %1530 = vmatprep.mubr.f32.mxu0 %v310_v1  ;;  %1079 = vmatmul.mubr.f32.gmra.mrb[10].mxu1 %v301_v2  ;;  %v2090_v62 = vpack.c.bf16 %v518_v57, %v516_v56  ;;  %v771_v1 = vld [vmem:[#allocation5 + $0xd40] sm:$0xff]  ;;  %v2346_v2 = vpack.c.bf16 %v774_v59, %v772_v58  ;;  %v536_v52 = vld [vmem:[#allocation5 + $0x5e8] sm:$0xff]  ;;  %v794_v55 = vld [vmem:[#allocation5 + $0xdf8] sm:$0xff] }
 0x103   : > { %2073 = vmatpush1.bf16.msra.mxu1 %v2072_v63  ;;  %1531 = vmatmul.mubr.f32.gmra.mrb[10].mxu0 %v309_v7  ;;  %v515_v63 = vld [vmem:[#allocation5 + $0x540] sm:$0xff]  ;;  %v778_v7 = vld [vmem:[#allocation5 + $0xd78] sm:$0xff]  ;;  %v2110_v58 = vpack.c.bf16 %v538_v53, %v536_v52  ;;  %v553_v53 = vld [vmem:[#allocation5 + $0x670] sm:$0xff] }
 0x104   : > { %2329 = vmatpush1.bf16.msra.mxu0 %v2328_v3  ;;  %2075 = vmatprep.subr.bf16.mxu1 %v2074_v4  ;;  %v773_v3 = vld [vmem:[#allocation5 + $0xd50] sm:$0xff]  ;;  %v520_v4 = vld [vmem:[#allocation5 + $0x568] sm:$0xff]  ;;  %v535_v59 = vld [vmem:[#allocation5 + $0x5e0] sm:$0xff] }
 0x105   : > { %2331 = vmatprep.subr.bf16.mxu0 %v2330_v8  ;;  %1084 = vmatprep.mubr.f32.mxu1 %v318_v14  ;;  %v2092_v8 = vpack.c.bf16 %v517_v0, %v515_v63  ;;  %v2348_v9 = vpack.c.bf16 %v773_v3, %v771_v1  ;;  %v2094_v10 = vpack.c.bf16 %v522_v5, %v520_v4  ;;  %v793_v63 = vld [vmem:[#allocation5 + $0xdf0] sm:$0xff]  ;;  %v540_v0 = vld [vmem:[#allocation5 + $0x608] sm:$0xff]  ;;  %v542_v1 = vld [vmem:[#allocation5 + $0x618] sm:$0xff] }
 0x106   : > { %1536 = vmatprep.mubr.f32.mxu0 %v326_v17  ;;  %1085 = vmatmul.mubr.f32.gmra.mrb[12].mxu1 %v317_v18  ;;  %v2350_v14 = vpack.c.bf16 %v778_v7, %v776_v6  ;;  %v526_v17 = vld [vmem:[#allocation5 + $0x598] sm:$0xff]  ;;  %v780_v18 = vld [vmem:[#allocation5 + $0xd88] sm:$0xff]  ;;  %v2114_v6 = vpack.c.bf16 %v542_v1, %v540_v0  ;;  %v539_v7 = vld [vmem:[#allocation5 + $0x600] sm:$0xff] }
 0x107   : > { %2077 = vmatpush1.bf16.msra.mxu1 %v2076_v15  ;;  %1537 = vmatmul.mubr.f32.gmra.mrb[12].mxu0 %v325_v23  ;;  %v777_v15 = vld [vmem:[#allocation5 + $0xd70] sm:$0xff]  ;;  %v2098_v22 = vpack.c.bf16 %v526_v17, %v524_v16  ;;  %v523_v23 = vld [vmem:[#allocation5 + $0x580] sm:$0xff]  ;;  %v798_v3 = vld [vmem:[#allocation5 + $0xe18] sm:$0xff] }
 0x108   : > { %2333 = vmatpush1.bf16.msra.mxu0 %v2332_v19  ;;  %2079 = vmatprep.subr.bf16.mxu1 %v2078_v20  ;;  %v782_v19 = vld [vmem:[#allocation5 + $0xd98] sm:$0xff]  ;;  %v2096_v20 = vpack.c.bf16 %v521_v12, %v519_v11  ;;  %v2352_v21 = vpack.c.bf16 %v777_v15, %v775_v13  ;;  %v797_v11 = vld [vmem:[#allocation5 + $0xe10] sm:$0xff]  ;;  %v544_v12 = vld [vmem:[#allocation5 + $0x628] sm:$0xff] }
 0x109   : > { %2335 = vmatprep.subr.bf16.mxu0 %v2334_v24  ;;  %1090 = vmatprep.mubr.f32.mxu1 %v334_v30  ;;  %v525_v24 = vld [vmem:[#allocation5 + $0x590] sm:$0xff]  ;;  %v2354_v26 = vpack.c.bf16 %v782_v19, %v780_v18  ;;  %v784_v30 = vld [vmem:[#allocation5 + $0xda8] sm:$0xff]  ;;  %v546_v13 = vld [vmem:[#allocation5 + $0x638] sm:$0xff] }
 0x10a   : > { %1542 = vmatprep.mubr.f32.mxu0 %v342_v33  ;;  %1091 = vmatmul.mubr.f32.gmra.mrb[14].mxu1 %v333_v34  ;;  %v2100_v32 = vpack.c.bf16 %v525_v24, %v523_v23  ;;  %v2356_v33 = vpack.c.bf16 %v781_v27, %v779_v25  ;;  %v2102_v34 = vpack.c.bf16 %v530_v29, %v528_v28  ;;  %v802_v15 = vld [vmem:[#allocation5 + $0xe38] sm:$0xff]  ;;  %v223_v16 = vld [vmem:[%s2999_s30 + $0x20] sm:$0xff]  ;;  %v801_v25 = vld [vmem:[#allocation5 + $0xe30] sm:$0xff] }
 0x10b   : > { %2081 = vmatpush1.bf16.msra.mxu1 %v2080_v31  ;;  %1543 = vmatmul.mubr.f32.gmra.mrb[14].mxu0 %v341_v39  ;;  %v786_v31 = vld [vmem:[#allocation5 + $0xdb8] sm:$0xff]  ;;  %v785_v39 = vld [vmem:[#allocation5 + $0xdb0] sm:$0xff]  ;;  %v231_v18 = vld [vmem:[%s2999_s30 + $0x60] sm:$0xff] }
 0x10c   : > { %2337 = vmatpush1.bf16.msra.mxu0 %v2336_v35  ;;  %2083 = vmatprep.subr.bf16.mxu1 %v2082_v36  ;;  %v527_v35 = vld [vmem:[#allocation5 + $0x5a0] sm:$0xff]  ;;  %v529_v36 = vld [vmem:[#allocation5 + $0x5b0] sm:$0xff]  ;;  %v2358_v38 = vpack.c.bf16 %v786_v31, %v784_v30  ;;  %v2360_v45 = vpack.c.bf16 %v785_v39, %v783_v37  ;;  %v550_v27 = vld [vmem:[#allocation5 + $0x658] sm:$0xff] }
 0x10d   : > { %2339 = vmatprep.subr.bf16.mxu0 %v2338_v40  ;;  %1161 = vmatprep.mubr.f32.mxu1 %v224_v46  ;;  %v532_v40 = vld [vmem:[#allocation5 + $0x5c8] sm:$0xff]  ;;  %v2104_v44 = vpack.c.bf16 %v529_v36, %v527_v35  ;;  %v799_v23 = vld [vmem:[#allocation5 + $0xe20] sm:$0xff]  ;;  %v806_v29 = vld [vmem:[#allocation5 + $0xe58] sm:$0xff] }
 0x10e   : > { %1613 = vmatprep.mubr.f32.mxu0 %v232_v48  ;;  %v2106_v46 = vpack.c.bf16 %v534_v41, %v532_v40  ;;  %v533_v48 = vld [vmem:[#allocation5 + $0x5d0] sm:$0xff]  ;;  %v804_v28 = vld [vmem:[#allocation5 + $0xe48] sm:$0xff]  ;;  %v2376_v35 = vpack.c.bf16 %v801_v25, %v799_v23  ;;  %v247_v39 = vld [vmem:[%s2999_s30 + $0xe0] sm:$0xff] }
 0x10f   : > { %2085 = vmatpush1.bf16.msra.mxu1 %v2084_v47  ;;  %v531_v47 = vld [vmem:[#allocation5 + $0x5c0] sm:$0xff]  ;;  %v240_v30 = vld [vmem:[%s2999_s30 + $0xa8] sm:$0xff]  ;;  %v549_v37 = vld [vmem:[#allocation5 + $0x650] sm:$0xff]  ;;  %v2378_v40 = vpack.c.bf16 %v806_v29, %v804_v28 }
 0x110   : > { %2341 = vmatpush1.bf16.msra.mxu0 %v2340_v49  ;;  %2087 = vmatprep.subr.bf16.mxu1 %v2086_v50  ;;  %v787_v49 = vld [vmem:[#allocation5 + $0xdc0] sm:$0xff]  ;;  %v2362_v50 = vpack.c.bf16 %v790_v43, %v788_v42  ;;  %v2108_v56 = vpack.c.bf16 %v533_v48, %v531_v47  ;;  %v805_v41 = vld [vmem:[#allocation5 + $0xe50] sm:$0xff]  ;;  %v552_v42 = vld [vmem:[#allocation5 + $0x668] sm:$0xff] }
 0x111   : > { %2343 = vmatprep.subr.bf16.mxu0 %v2342_v54  ;;  %v792_v54 = vld [vmem:[#allocation5 + $0xde8] sm:$0xff]  ;;  %v2364_v57 = vpack.c.bf16 %v789_v51, %v787_v49  ;;  %v554_v43 = vld [vmem:[#allocation5 + $0x678] sm:$0xff]  ;;  %v551_v48 = vld [vmem:[#allocation5 + $0x660] sm:$0xff] }
 0x112   : > { %v264_v49 = vld [vmem:[%s2999_s30 + $0x168] sm:$0xff]  ;;  %v2126_v52 = vpack.c.bf16 %v554_v43, %v552_v42  ;;  %v555_v0 = vld [vmem:[#allocation5 + $0x680] sm:$0xff]  ;;  %v817_v25 = vld [vmem:[#allocation5 + $0xeb0] sm:$0xff] }
 0x113   : > { %2089 = vmatpush1.bf16.msra.mxu1 %v2088_v60  ;;  %v537_v60 = vld [vmem:[#allocation5 + $0x5f0] sm:$0xff]  ;;  %v280_v1 = vld [vmem:[%s2999_s30 + $0x1e8] sm:$0xff]  ;;  %v295_v23 = vld [vmem:[%s2999_s30 + $0x260] sm:$0xff] }
 0x114   : > { %2345 = vmatpush1.bf16.msra.mxu0 %v2344_v61  ;;  %2091 = vmatprep.subr.bf16.mxu1 %v2090_v62  ;;  %v791_v61 = vld [vmem:[#allocation5 + $0xde0] sm:$0xff]  ;;  %v2366_v62 = vpack.c.bf16 %v794_v55, %v792_v54  ;;  %v2112_v4 = vpack.c.bf16 %v537_v60, %v535_v59  ;;  %v558_v59 = vld [vmem:[#allocation5 + $0x698] sm:$0xff]  ;;  %v812_v60 = vld [vmem:[#allocation5 + $0xe88] sm:$0xff] }
 0x115   : > { %2347 = vmatprep.subr.bf16.mxu0 %v2346_v2  ;;  %v796_v2 = vld [vmem:[#allocation5 + $0xe08] sm:$0xff]  ;;  %v2368_v5 = vpack.c.bf16 %v793_v63, %v791_v61  ;;  %v807_v54 = vld [vmem:[#allocation5 + $0xe60] sm:$0xff]  ;;  %v814_v61 = vld [vmem:[#allocation5 + $0xe98] sm:$0xff]  ;;  %v2128_v63 = vpack.c.bf16 %v553_v53, %v551_v48 }
 0x116   : > { %v263_v55 = vld [vmem:[%s2999_s30 + $0x160] sm:$0xff]  ;;  %v820_v28 = vld [vmem:[#allocation5 + $0xec8] sm:$0xff]  ;;  %v822_v29 = vld [vmem:[#allocation5 + $0xed8] sm:$0xff] }
 0x117   : > { %2093 = vmatpush1.bf16.msra.mxu1 %v2092_v8  ;;  %v541_v8 = vld [vmem:[#allocation5 + $0x610] sm:$0xff]  ;;  %v568_v42 = vld [vmem:[#allocation5 + $0x6e8] sm:$0xff]  ;;  %v570_v43 = vld [vmem:[#allocation5 + $0x6f8] sm:$0xff] }
 0x118   : > { %2349 = vmatpush1.bf16.msra.mxu0 %v2348_v9  ;;  %2095 = vmatprep.subr.bf16.mxu1 %v2094_v10  ;;  %v795_v9 = vld [vmem:[#allocation5 + $0xe00] sm:$0xff]  ;;  %v2370_v10 = vpack.c.bf16 %v798_v3, %v796_v2  ;;  %v2116_v17 = vpack.c.bf16 %v541_v8, %v539_v7  ;;  %v2386_v8 = vpack.c.bf16 %v814_v61, %v812_v60  ;;  %v569_v53 = vld [vmem:[#allocation5 + $0x6f0] sm:$0xff]  ;;  %v828_v60 = vld [vmem:[#allocation5 + $0xf08] sm:$0xff] }
 0x119   : > { %2351 = vmatprep.subr.bf16.mxu0 %v2350_v14  ;;  %v800_v14 = vld [vmem:[#allocation5 + $0xe28] sm:$0xff]  ;;  %v2372_v19 = vpack.c.bf16 %v797_v11, %v795_v9  ;;  %v271_v2 = vld [vmem:[%s2999_s30 + $0x1a0] sm:$0xff]  ;;  %v813_v9 = vld [vmem:[#allocation5 + $0xe90] sm:$0xff] }
 0x11a   : > { %v2374_v24 = vpack.c.bf16 %v802_v15, %v800_v14  ;;  %v279_v7 = vld [vmem:[%s2999_s30 + $0x1e0] sm:$0xff]  ;;  %v562_v11 = vld [vmem:[#allocation5 + $0x6b8] sm:$0xff]  ;;  %v288_v14 = vld [vmem:[%s2999_s30 + $0x228] sm:$0xff] }
 0x11b   : > { %2097 = vmatpush1.bf16.msra.mxu1 %v2096_v20  ;;  %v2118_v20 = vpack.c.bf16 %v546_v13, %v544_v12  ;;  %v816_v12 = vld [vmem:[#allocation5 + $0xea8] sm:$0xff]  ;;  %v818_v13 = vld [vmem:[#allocation5 + $0xeb8] sm:$0xff]  ;;  %v567_v48 = vld [vmem:[#allocation5 + $0x6e0] sm:$0xff] }
 0x11c   : > { %2353 = vmatpush1.bf16.msra.mxu0 %v2352_v21  ;;  %2099 = vmatprep.subr.bf16.mxu1 %v2098_v22  ;;  %v543_v21 = vld [vmem:[#allocation5 + $0x620] sm:$0xff]  ;;  %v545_v22 = vld [vmem:[#allocation5 + $0x630] sm:$0xff]  ;;  %v830_v61 = vld [vmem:[#allocation5 + $0xf18] sm:$0xff] }
 0x11d   : > { %2355 = vmatprep.subr.bf16.mxu0 %v2354_v26  ;;  %v548_v26 = vld [vmem:[#allocation5 + $0x648] sm:$0xff]  ;;  %v2120_v31 = vpack.c.bf16 %v545_v22, %v543_v21  ;;  %v561_v21 = vld [vmem:[#allocation5 + $0x6b0] sm:$0xff]  ;;  %v815_v22 = vld [vmem:[#allocation5 + $0xea0] sm:$0xff] }
 0x11e   : > { %v2122_v36 = vpack.c.bf16 %v550_v27, %v548_v26  ;;  %v564_v26 = vld [vmem:[#allocation5 + $0x6c8] sm:$0xff]  ;;  %v566_v27 = vld [vmem:[#allocation5 + $0x6d8] sm:$0xff] }
 0x11f   : > { %2101 = vmatpush1.bf16.msra.mxu1 %v2100_v32  ;;  %v547_v32 = vld [vmem:[#allocation5 + $0x640] sm:$0xff] }
 0x120   : > { %2357 = vmatpush1.bf16.msra.mxu0 %v2356_v33  ;;  %2103 = vmatprep.subr.bf16.mxu1 %v2102_v34  ;;  %v248_v33 = vld [vmem:[%s2999_s30 + $0xe8] sm:$0xff]  ;;  %v239_v34 = vld [vmem:[%s2999_s30 + $0xa0] sm:$0xff]  ;;  %v2124_v47 = vpack.c.bf16 %v549_v37, %v547_v32  ;;  %v565_v37 = vld [vmem:[#allocation5 + $0x6d0] sm:$0xff] }
 0x121   : > { %2359 = vmatprep.subr.bf16.mxu0 %v2358_v38  ;;  %v803_v38 = vld [vmem:[#allocation5 + $0xe40] sm:$0xff] }
 0x122   : > { %v2380_v51 = vpack.c.bf16 %v805_v41, %v803_v38  ;;  %v563_v32 = vld [vmem:[#allocation5 + $0x6c0] sm:$0xff]  ;;  %v821_v41 = vld [vmem:[#allocation5 + $0xed0] sm:$0xff] }
 0x123   : > { %2105 = vmatpush1.bf16.msra.mxu1 %v2104_v44  ;;  %v808_v44 = vld [vmem:[#allocation5 + $0xe68] sm:$0xff]  ;;  %v819_v38 = vld [vmem:[#allocation5 + $0xec0] sm:$0xff] }
 0x124   : > { %2361 = vmatpush1.bf16.msra.mxu0 %v2360_v45  ;;  %2107 = vmatprep.subr.bf16.mxu1 %v2106_v46  ;;  %v810_v45 = vld [vmem:[#allocation5 + $0xe78] sm:$0xff]  ;;  %v256_v46 = vld [vmem:[%s2999_s30 + $0x128] sm:$0xff] }
 0x125   : > { %2363 = vmatprep.subr.bf16.mxu0 %v2362_v50  ;;  %v255_v50 = vld [vmem:[%s2999_s30 + $0x120] sm:$0xff] }
 0x127   : > { %2109 = vmatpush1.bf16.msra.mxu1 %v2108_v56  ;;  %v2382_v56 = vpack.c.bf16 %v810_v45, %v808_v44  ;;  %v824_v44 = vld [vmem:[#allocation5 + $0xee8] sm:$0xff]  ;;  %v826_v45 = vld [vmem:[#allocation5 + $0xef8] sm:$0xff] }
 0x128   : > { %2365 = vmatpush1.bf16.msra.mxu0 %v2364_v57  ;;  %2111 = vmatprep.subr.bf16.mxu1 %v2110_v58  ;;  %v809_v57 = vld [vmem:[#allocation5 + $0xe70] sm:$0xff]  ;;  %v556_v58 = vld [vmem:[#allocation5 + $0x688] sm:$0xff] }
 0x129   : > { %2367 = vmatprep.subr.bf16.mxu0 %v2366_v62  ;;  %v272_v62 = vld [vmem:[%s2999_s30 + $0x1a8] sm:$0xff]  ;;  %v2384_v3 = vpack.c.bf16 %v809_v57, %v807_v54  ;;  %v823_v54 = vld [vmem:[#allocation5 + $0xee0] sm:$0xff]  ;;  %v825_v57 = vld [vmem:[#allocation5 + $0xef0] sm:$0xff] }
 0x12b   : > { %2113 = vmatpush1.bf16.msra.mxu1 %v2112_v4  ;;  %v2130_v4 = vpack.c.bf16 %v558_v59, %v556_v58  ;;  %v572_v58 = vld [vmem:[#allocation5 + $0x708] sm:$0xff]  ;;  %v574_v59 = vld [vmem:[#allocation5 + $0x718] sm:$0xff] }
 0x12c   : > { %2369 = vmatpush1.bf16.msra.mxu0 %v2368_v5  ;;  %2115 = vmatprep.subr.bf16.mxu1 %v2114_v6  ;;  %v557_v5 = vld [vmem:[#allocation5 + $0x690] sm:$0xff]  ;;  %v811_v6 = vld [vmem:[#allocation5 + $0xe80] sm:$0xff] }
 0x12d   : > { %2371 = vmatprep.subr.bf16.mxu0 %v2370_v10  ;;  %v560_v10 = vld [vmem:[#allocation5 + $0x6a8] sm:$0xff]  ;;  %v2132_v15 = vpack.c.bf16 %v557_v5, %v555_v0  ;;  %v571_v0 = vld [vmem:[#allocation5 + $0x700] sm:$0xff]  ;;  %v573_v5 = vld [vmem:[#allocation5 + $0x710] sm:$0xff] }
 0x12e   : > { %1162 = vmatmul.mubr.f32.vlgmr.msra.gmra.mrb[0].mxu1 %v223_v16  ;;  %v559_v16 = vld [vmem:[#allocation5 + $0x6a0] sm:$0xff] }
 0x12f   : > { %2117 = vmatpush1.bf16.msra.mxu1 %v2116_v17  ;;  %1614 = vmatmul.mubr.f32.vlgmr.msra.gmra.mrb[0].mxu0 %v231_v18  ;;  %v296_v17 = vld [vmem:[%s2999_s30 + $0x268] sm:$0xff]  ;;  %v287_v18 = vld [vmem:[%s2999_s30 + $0x220] sm:$0xff] }
 0x130   : > { %2373 = vmatpush1.bf16.msra.mxu0 %v2372_v19  ;;  %2119 = vmatprep.subr.bf16.mxu1 %v2118_v20  ;;  %v2388_v19 = vpack.c.bf16 %v813_v9, %v811_v6  ;;  %v2134_v20 = vpack.c.bf16 %v562_v11, %v560_v10  ;;  %v827_v6 = vld [vmem:[#allocation5 + $0xf00] sm:$0xff]  ;;  %v829_v9 = vld [vmem:[#allocation5 + $0xf10] sm:$0xff]  ;;  %v576_v10 = vld [vmem:[#allocation5 + $0x728] sm:$0xff] }
 0x131   : > { %2375 = vmatprep.subr.bf16.mxu0 %v2374_v24  ;;  %1167 = vmatprep.mubr.f32.mxu1 %v240_v30  ;;  %v2390_v24 = vpack.c.bf16 %v818_v13, %v816_v12  ;;  %v304_v30 = vld [vmem:[%s2999_s30 + $0x2a8] sm:$0xff]  ;;  %v578_v11 = vld [vmem:[#allocation5 + $0x738] sm:$0xff] }
 0x132   : > { %1619 = vmatprep.mubr.f32.mxu0 %v248_v33  ;;  %1168 = vmatmul.mubr.f32.gmra.mrb[2].mxu1 %v239_v34  ;;  %v312_v33 = vld [vmem:[%s2999_s30 + $0x2e8] sm:$0xff]  ;;  %v303_v34 = vld [vmem:[%s2999_s30 + $0x2a0] sm:$0xff]  ;;  %v834_v13 = vld [vmem:[#allocation5 + $0xf38] sm:$0xff] }
 0x133   : > { %2121 = vmatpush1.bf16.msra.mxu1 %v2120_v31  ;;  %1620 = vmatmul.mubr.f32.gmra.mrb[2].mxu0 %v247_v39  ;;  %v2136_v31 = vpack.c.bf16 %v561_v21, %v559_v16  ;;  %v311_v39 = vld [vmem:[%s2999_s30 + $0x2e0] sm:$0xff]  ;;  %v832_v12 = vld [vmem:[#allocation5 + $0xf28] sm:$0xff]  ;;  %v234_v16 = vld [vmem:[%s2999_s30 + $0x78] sm:$0xff] }
 0x134   : > { %2377 = vmatpush1.bf16.msra.mxu0 %v2376_v35  ;;  %2123 = vmatprep.subr.bf16.mxu1 %v2122_v36  ;;  %v2392_v35 = vpack.c.bf16 %v817_v25, %v815_v22  ;;  %v2138_v36 = vpack.c.bf16 %v566_v27, %v564_v26  ;;  %v831_v21 = vld [vmem:[#allocation5 + $0xf20] sm:$0xff]  ;;  %v2406_v22 = vpack.c.bf16 %v834_v13, %v832_v12  ;;  %v582_v25 = vld [vmem:[#allocation5 + $0x758] sm:$0xff]  ;;  %v836_v26 = vld [vmem:[#allocation5 + $0xf48] sm:$0xff] }
 0x135   : > { %2379 = vmatprep.subr.bf16.mxu0 %v2378_v40  ;;  %1173 = vmatprep.mubr.f32.mxu1 %v256_v46  ;;  %v2394_v40 = vpack.c.bf16 %v822_v29, %v820_v28  ;;  %v320_v46 = vld [vmem:[%s2999_s30 + $0x328] sm:$0xff]  ;;  %v838_v27 = vld [vmem:[#allocation5 + $0xf58] sm:$0xff] }
 0x136   : > { %1625 = vmatprep.mubr.f32.mxu0 %v264_v49  ;;  %1174 = vmatmul.mubr.f32.gmra.mrb[4].mxu1 %v255_v50  ;;  %v328_v49 = vld [vmem:[%s2999_s30 + $0x368] sm:$0xff]  ;;  %v319_v50 = vld [vmem:[%s2999_s30 + $0x320] sm:$0xff] }
 0x137   : > { %2125 = vmatpush1.bf16.msra.mxu1 %v2124_v47  ;;  %1626 = vmatmul.mubr.f32.gmra.mrb[4].mxu0 %v263_v55  ;;  %v2140_v47 = vpack.c.bf16 %v565_v37, %v563_v32  ;;  %v327_v55 = vld [vmem:[%s2999_s30 + $0x360] sm:$0xff]  ;;  %v581_v32 = vld [vmem:[#allocation5 + $0x750] sm:$0xff]  ;;  %v586_v37 = vld [vmem:[#allocation5 + $0x778] sm:$0xff] }
 0x138   : > { %2381 = vmatpush1.bf16.msra.mxu0 %v2380_v51  ;;  %2127 = vmatprep.subr.bf16.mxu1 %v2126_v52  ;;  %v2396_v51 = vpack.c.bf16 %v821_v41, %v819_v38  ;;  %v2142_v52 = vpack.c.bf16 %v570_v43, %v568_v42  ;;  %v840_v38 = vld [vmem:[#allocation5 + $0xf68] sm:$0xff]  ;;  %v583_v43 = vld [vmem:[#allocation5 + $0x760] sm:$0xff] }
 0x139   : > { %2383 = vmatprep.subr.bf16.mxu0 %v2382_v56  ;;  %1179 = vmatprep.mubr.f32.mxu1 %v272_v62  ;;  %v2398_v56 = vpack.c.bf16 %v826_v45, %v824_v44  ;;  %v336_v62 = vld [vmem:[%s2999_s30 + $0x3a8] sm:$0xff]  ;;  %v585_v44 = vld [vmem:[#allocation5 + $0x770] sm:$0xff]  ;;  %v839_v45 = vld [vmem:[#allocation5 + $0xf60] sm:$0xff] }
 0x13a   : > { %1631 = vmatprep.mubr.f32.mxu0 %v280_v1  ;;  %1180 = vmatmul.mubr.f32.gmra.mrb[6].mxu1 %v271_v2  ;;  %v344_v1 = vld [vmem:[%s2999_s30 + $0x3e8] sm:$0xff]  ;;  %v335_v2 = vld [vmem:[%s2999_s30 + $0x3a0] sm:$0xff] }
 0x13b   : > { %2129 = vmatpush1.bf16.msra.mxu1 %v2128_v63  ;;  %1632 = vmatmul.mubr.f32.gmra.mrb[6].mxu0 %v279_v7  ;;  %v2144_v63 = vpack.c.bf16 %v569_v53, %v567_v48  ;;  %v343_v7 = vld [vmem:[%s2999_s30 + $0x3e0] sm:$0xff]  ;;  %v588_v48 = vld [vmem:[#allocation5 + $0x788] sm:$0xff] }
 0x13c   : > { %2385 = vmatpush1.bf16.msra.mxu0 %v2384_v3  ;;  %2131 = vmatprep.subr.bf16.mxu1 %v2130_v4  ;;  %v2400_v3 = vpack.c.bf16 %v825_v57, %v823_v54  ;;  %v2146_v4 = vpack.c.bf16 %v574_v59, %v572_v58  ;;  %v843_v57 = vld [vmem:[#allocation5 + $0xf80] sm:$0xff]  ;;  %v845_v59 = vld [vmem:[#allocation5 + $0xf90] sm:$0xff] }
 0x13d   : > { %2387 = vmatprep.subr.bf16.mxu0 %v2386_v8  ;;  %1185 = vmatprep.mubr.f32.mxu1 %v288_v14  ;;  %v2402_v8 = vpack.c.bf16 %v830_v61, %v828_v60  ;;  %v226_v14 = vld [vmem:[%s2999_s30 + $0x38] sm:$0xff]  ;;  %v592_v60 = vld [vmem:[#allocation5 + $0x7a8] sm:$0xff] }
 0x13e   : > { %1637 = vmatprep.mubr.f32.mxu0 %v296_v17  ;;  %1186 = vmatmul.mubr.f32.gmra.mrb[8].mxu1 %v287_v18  ;;  %v2404_v17 = vpack.c.bf16 %v829_v9, %v827_v6  ;;  %v2150_v18 = vpack.c.bf16 %v578_v11, %v576_v10  ;;  %v594_v61 = vld [vmem:[#allocation5 + $0x7b8] sm:$0xff]  ;;  %v852_v10 = vld [vmem:[#allocation5 + $0xfc8] sm:$0xff] }
 0x13f   : > { %2133 = vmatpush1.bf16.msra.mxu1 %v2132_v15  ;;  %1638 = vmatmul.mubr.f32.gmra.mrb[8].mxu0 %v295_v23  ;;  %v2148_v15 = vpack.c.bf16 %v573_v5, %v571_v0  ;;  %v833_v23 = vld [vmem:[#allocation5 + $0xf30] sm:$0xff]  ;;  %v847_v5 = vld [vmem:[#allocation5 + $0xfa0] sm:$0xff]  ;;  %v598_v9 = vld [vmem:[#allocation5 + $0x7d8] sm:$0xff] }
 0x140   : > { %2389 = vmatpush1.bf16.msra.mxu0 %v2388_v19  ;;  %2135 = vmatprep.subr.bf16.mxu1 %v2134_v20  ;;  %v575_v19 = vld [vmem:[#allocation5 + $0x720] sm:$0xff]  ;;  %v577_v20 = vld [vmem:[#allocation5 + $0x730] sm:$0xff]  ;;  %v2408_v29 = vpack.c.bf16 %v833_v23, %v831_v21  ;;  %v854_v11 = vld [vmem:[#allocation5 + $0xfd8] sm:$0xff] }
 0x141   : > { %2391 = vmatprep.subr.bf16.mxu0 %v2390_v24  ;;  %1191 = vmatprep.mubr.f32.mxu1 %v304_v30  ;;  %v580_v24 = vld [vmem:[#allocation5 + $0x748] sm:$0xff]  ;;  %v2152_v28 = vpack.c.bf16 %v577_v20, %v575_v19  ;;  %v853_v19 = vld [vmem:[#allocation5 + $0xfd0] sm:$0xff]  ;;  %v602_v21 = vld [vmem:[#allocation5 + $0x7f8] sm:$0xff] }
 0x142   : > { %1643 = vmatprep.mubr.f32.mxu0 %v312_v33  ;;  %1192 = vmatmul.mubr.f32.gmra.mrb[10].mxu1 %v303_v34  ;;  %v2154_v30 = vpack.c.bf16 %v582_v25, %v580_v24  ;;  %v835_v33 = vld [vmem:[#allocation5 + $0xf40] sm:$0xff]  ;;  %v2410_v34 = vpack.c.bf16 %v838_v27, %v836_v26  ;;  %v600_v20 = vld [vmem:[#allocation5 + $0x7e8] sm:$0xff]  ;;  %v858_v23 = vld [vmem:[#allocation5 + $0xff8] sm:$0xff] }
 0x143   : > { %2137 = vmatpush1.bf16.msra.mxu1 %v2136_v31  ;;  %1644 = vmatmul.mubr.f32.gmra.mrb[10].mxu0 %v311_v39  ;;  %v579_v31 = vld [vmem:[#allocation5 + $0x740] sm:$0xff]  ;;  %v842_v39 = vld [vmem:[#allocation5 + $0xf78] sm:$0xff]  ;;  %v2174_v26 = vpack.c.bf16 %v602_v21, %v600_v20 }
 0x144   : > { %2393 = vmatpush1.bf16.msra.mxu0 %v2392_v35  ;;  %2139 = vmatprep.subr.bf16.mxu1 %v2138_v36  ;;  %v837_v35 = vld [vmem:[#allocation5 + $0xf50] sm:$0xff]  ;;  %v584_v36 = vld [vmem:[#allocation5 + $0x768] sm:$0xff]  ;;  %v599_v27 = vld [vmem:[#allocation5 + $0x7e0] sm:$0xff] }
 0x145   : > { %2395 = vmatprep.subr.bf16.mxu0 %v2394_v40  ;;  %1197 = vmatprep.mubr.f32.mxu1 %v320_v46  ;;  %v2156_v40 = vpack.c.bf16 %v581_v32, %v579_v31  ;;  %v2412_v41 = vpack.c.bf16 %v837_v35, %v835_v33  ;;  %v2158_v42 = vpack.c.bf16 %v586_v37, %v584_v36  ;;  %v857_v31 = vld [vmem:[#allocation5 + $0xff0] sm:$0xff]  ;;  %v242_v36 = vld [vmem:[%s2999_s30 + $0xb8] sm:$0xff] }
 0x146   : > { %1649 = vmatprep.mubr.f32.mxu0 %v328_v49  ;;  %1198 = vmatmul.mubr.f32.gmra.mrb[12].mxu1 %v319_v50  ;;  %v2414_v46 = vpack.c.bf16 %v842_v39, %v840_v38  ;;  %v590_v49 = vld [vmem:[#allocation5 + $0x798] sm:$0xff]  ;;  %v844_v50 = vld [vmem:[#allocation5 + $0xf88] sm:$0xff]  ;;  %v233_v35 = vld [vmem:[%s2999_s30 + $0x70] sm:$0xff] }
 0x147   : > { %2141 = vmatpush1.bf16.msra.mxu1 %v2140_v47  ;;  %1650 = vmatmul.mubr.f32.gmra.mrb[12].mxu0 %v327_v55  ;;  %v841_v47 = vld [vmem:[#allocation5 + $0xf70] sm:$0xff]  ;;  %v2162_v54 = vpack.c.bf16 %v590_v49, %v588_v48  ;;  %v587_v55 = vld [vmem:[#allocation5 + $0x780] sm:$0xff]  ;;  %v250_v37 = vld [vmem:[%s2999_s30 + $0xf8] sm:$0xff] }
 0x148   : > { %2397 = vmatpush1.bf16.msra.mxu0 %v2396_v51  ;;  %2143 = vmatprep.subr.bf16.mxu1 %v2142_v52  ;;  %v846_v51 = vld [vmem:[#allocation5 + $0xf98] sm:$0xff]  ;;  %v2160_v52 = vpack.c.bf16 %v585_v44, %v583_v43  ;;  %v2416_v53 = vpack.c.bf16 %v841_v47, %v839_v45  ;;  %v241_v38 = vld [vmem:[%s2999_s30 + $0xb0] sm:$0xff] }
 0x149   : > { %2399 = vmatprep.subr.bf16.mxu0 %v2398_v56  ;;  %1203 = vmatprep.mubr.f32.mxu1 %v336_v62  ;;  %v589_v56 = vld [vmem:[#allocation5 + $0x790] sm:$0xff]  ;;  %v2418_v58 = vpack.c.bf16 %v846_v51, %v844_v50  ;;  %v848_v62 = vld [vmem:[#allocation5 + $0xfa8] sm:$0xff]  ;;  %v274_v44 = vld [vmem:[%s2999_s30 + $0x1b8] sm:$0xff] }
 0x14a   : > { %1655 = vmatprep.mubr.f32.mxu0 %v344_v1  ;;  %1204 = vmatmul.mubr.f32.gmra.mrb[14].mxu1 %v335_v2  ;;  %v2164_v0 = vpack.c.bf16 %v589_v56, %v587_v55  ;;  %v2420_v1 = vpack.c.bf16 %v845_v59, %v843_v57  ;;  %v2166_v2 = vpack.c.bf16 %v594_v61, %v592_v60  ;;  %v249_v39 = vld [vmem:[%s2999_s30 + $0xf0] sm:$0xff]  ;;  %v282_v45 = vld [vmem:[%s2999_s30 + $0x1f8] sm:$0xff] }
 0x14b   : > { %2145 = vmatpush1.bf16.msra.mxu1 %v2144_v63  ;;  %1656 = vmatmul.mubr.f32.gmra.mrb[14].mxu0 %v343_v7  ;;  %v850_v63 = vld [vmem:[#allocation5 + $0xfb8] sm:$0xff]  ;;  %v849_v7 = vld [vmem:[#allocation5 + $0xfb0] sm:$0xff] }
 0x14c   : > { %2401 = vmatpush1.bf16.msra.mxu0 %v2400_v3  ;;  %2147 = vmatprep.subr.bf16.mxu1 %v2146_v4  ;;  %v591_v3 = vld [vmem:[#allocation5 + $0x7a0] sm:$0xff]  ;;  %v593_v4 = vld [vmem:[#allocation5 + $0x7b0] sm:$0xff]  ;;  %v2422_v6 = vpack.c.bf16 %v850_v63, %v848_v62  ;;  %v2424_v13 = vpack.c.bf16 %v849_v7, %v847_v5  ;;  %v290_v48 = vld [vmem:[%s2999_s30 + $0x238] sm:$0xff] }
 0x14d   : > { %2403 = vmatprep.subr.bf16.mxu0 %v2402_v8  ;;  %1274 = vmatprep.mubr.f32.mxu1 %v226_v14  ;;  %v596_v8 = vld [vmem:[#allocation5 + $0x7c8] sm:$0xff]  ;;  %v2168_v12 = vpack.c.bf16 %v593_v4, %v591_v3  ;;  %v265_v43 = vld [vmem:[%s2999_s30 + $0x170] sm:$0xff]  ;;  %v298_v49 = vld [vmem:[%s2999_s30 + $0x278] sm:$0xff] }
 0x14e   : > { %1726 = vmatprep.mubr.f32.mxu0 %v234_v16  ;;  %v2170_v14 = vpack.c.bf16 %v598_v9, %v596_v8  ;;  %v597_v16 = vld [vmem:[#allocation5 + $0x7d0] sm:$0xff]  ;;  %v322_v56 = vld [vmem:[%s2999_s30 + $0x338] sm:$0xff]  ;;  %v859_v3 = vld [vmem:[#allocation7] sm:$0x3] }
 0x14f   : > { %2149 = vmatpush1.bf16.msra.mxu1 %v2148_v15  ;;  %v595_v15 = vld [vmem:[#allocation5 + $0x7c0] sm:$0xff]  ;;  %v281_v47 = vld [vmem:[%s2999_s30 + $0x1f0] sm:$0xff]  ;;  %v330_v57 = vld [vmem:[%s2999_s30 + $0x378] sm:$0xff] }
 0x150   : > { %2405 = vmatpush1.bf16.msra.mxu0 %v2404_v17  ;;  %2151 = vmatprep.subr.bf16.mxu1 %v2150_v18  ;;  %v851_v17 = vld [vmem:[#allocation5 + $0xfc0] sm:$0xff]  ;;  %v2426_v18 = vpack.c.bf16 %v854_v11, %v852_v10  ;;  %v2172_v24 = vpack.c.bf16 %v597_v16, %v595_v15  ;;  %v289_v50 = vld [vmem:[%s2999_s30 + $0x230] sm:$0xff]  ;;  %v338_v60 = vld [vmem:[%s2999_s30 + $0x3b8] sm:$0xff] }
 0x151   : > { %2407 = vmatprep.subr.bf16.mxu0 %v2406_v22  ;;  %v856_v22 = vld [vmem:[#allocation5 + $0xfe8] sm:$0xff]  ;;  %v2428_v25 = vpack.c.bf16 %v853_v19, %v851_v17  ;;  %v297_v51 = vld [vmem:[%s2999_s30 + $0x270] sm:$0xff]  ;;  %v346_v61 = vld [vmem:[%s2999_s30 + $0x3f8] sm:$0xff] }
 0x152   : > { %v313_v55 = vld [vmem:[%s2999_s30 + $0x2f0] sm:$0xff] }
 0x153   : > { %2153 = vmatpush1.bf16.msra.mxu1 %v2152_v28  ;;  %v601_v28 = vld [vmem:[#allocation5 + $0x7f0] sm:$0xff] }
 0x154   : > { %2409 = vmatpush1.bf16.msra.mxu0 %v2408_v29  ;;  %2155 = vmatprep.subr.bf16.mxu1 %v2154_v30  ;;  %v2430_v29 = vpack.c.bf16 %v858_v23, %v856_v22  ;;  %v855_v30 = vld [vmem:[#allocation5 + $0xfe0] sm:$0xff]  ;;  %v2176_v32 = vpack.c.bf16 %v601_v28, %v599_v27  ;;  %v329_v59 = vld [vmem:[%s2999_s30 + $0x370] sm:$0xff] }
 0x155   : > { %2411 = vmatprep.subr.bf16.mxu0 %v2410_v34  ;;  %v2432_v33 = vpack.c.bf16 %v857_v31, %v855_v30  ;;  %v225_v34 = vld [vmem:[%s2999_s30 + $0x30] sm:$0xff] }
 0x156   : > { %v337_v62 = vld [vmem:[%s2999_s30 + $0x3b0] sm:$0xff] }
 0x157   : > { %2157 = vmatpush1.bf16.msra.mxu1 %v2156_v40  ;;  %v258_v40 = vld [vmem:[%s2999_s30 + $0x138] sm:$0xff]  ;;  %v345_v63 = vld [vmem:[%s2999_s30 + $0x3f0] sm:$0xff] }
 0x158   : > { %2413 = vmatpush1.bf16.msra.mxu0 %v2412_v41  ;;  %2159 = vmatprep.subr.bf16.mxu1 %v2158_v42  ;;  %v266_v41 = vld [vmem:[%s2999_s30 + $0x178] sm:$0xff]  ;;  %v257_v42 = vld [vmem:[%s2999_s30 + $0x130] sm:$0xff] }
 0x159   : > { %2415 = vmatprep.subr.bf16.mxu0 %v2414_v46  ;;  %v273_v46 = vld [vmem:[%s2999_s30 + $0x1b0] sm:$0xff] }
 0x15b   : > { %2161 = vmatpush1.bf16.msra.mxu1 %v2160_v52  ;;  %v306_v52 = vld [vmem:[%s2999_s30 + $0x2b8] sm:$0xff] }
 0x15c   : > { %2417 = vmatpush1.bf16.msra.mxu0 %v2416_v53  ;;  %2163 = vmatprep.subr.bf16.mxu1 %v2162_v54  ;;  %v314_v53 = vld [vmem:[%s2999_s30 + $0x2f8] sm:$0xff]  ;;  %v305_v54 = vld [vmem:[%s2999_s30 + $0x2b0] sm:$0xff] }
 0x15d   : > { %2419 = vmatprep.subr.bf16.mxu0 %v2418_v58  ;;  %v321_v58 = vld [vmem:[%s2999_s30 + $0x330] sm:$0xff] }
 0x15f   : > { %2165 = vmatpush1.bf16.msra.mxu1 %v2164_v0  ;;  %v861_v0 = vlaneseq }
 0x160   : > { %2421 = vmatpush1.bf16.msra.mxu0 %v2420_v1  ;;  %2167 = vmatprep.subr.bf16.mxu1 %v2166_v2 }
 0x161   : > { %2423 = vmatprep.subr.bf16.mxu0 %v2422_v6  ;;  %v862_v1 = vshrl.u32 %v861_v0, 7 }
 0x163   : > { %2169 = vmatpush1.bf16.msra.mxu1 %v2168_v12  ;;  %v863_v2 = vsub.s32 0, %v862_v1  ;;  %v867_v4 = vsub.s32 1, %v862_v1 }
 0x164   : > { %2425 = vmatpush1.bf16.msra.mxu0 %v2424_v13  ;;  %2171 = vmatprep.subr.bf16.mxu1 %v2170_v14 }
 0x165   : > { %2427 = vmatprep.subr.bf16.mxu0 %v2426_v18  ;;  %v3137_v5 = vrot.slane %v859_v3, %v863_v2  ;;  %v3139_v6 = vrot.slane %v859_v3, %v867_v4 }
 0x167   : > { %2173 = vmatpush1.bf16.msra.mxu1 %v2172_v24 }
 0x168   : > { %2429 = vmatpush1.bf16.msra.mxu0 %v2428_v25  ;;  %2175 = vmatprep.subr.bf16.mxu1 %v2174_v26 }
 0x169   : > { %2431 = vmatprep.subr.bf16.mxu0 %v2430_v29 }
 0x16b   : > { %2177 = vmatpush1.bf16.msra.mxu1 %v2176_v32 }
 0x16c   : > { %2433 = vmatpush1.bf16.msra.mxu0 %v2432_v33 }
 0x16e   : > { %1275 = vmatmul.mubr.f32.vlgmr.msra.gmra.mrb[0].mxu1 %v225_v34 }
 0x16f   : > { %1727 = vmatmul.mubr.f32.vlgmr.msra.gmra.mrb[0].mxu0 %v233_v35  ;;  %1280 = vmatprep.mubr.f32.mxu1 %v242_v36 }
 0x170   : > { %1732 = vmatprep.mubr.f32.mxu0 %v250_v37 }
 0x172   : > { %1281 = vmatmul.mubr.f32.gmra.mrb[2].mxu1 %v241_v38 }
 0x173   : > { %1733 = vmatmul.mubr.f32.gmra.mrb[2].mxu0 %v249_v39  ;;  %1286 = vmatprep.mubr.f32.mxu1 %v258_v40 }
 0x174   : > { %1738 = vmatprep.mubr.f32.mxu0 %v266_v41 }
 0x176   : > { %1287 = vmatmul.mubr.f32.gmra.mrb[4].mxu1 %v257_v42 }
 0x177   : > { %1739 = vmatmul.mubr.f32.gmra.mrb[4].mxu0 %v265_v43  ;;  %1292 = vmatprep.mubr.f32.mxu1 %v274_v44 }
 0x178   : > { %1744 = vmatprep.mubr.f32.mxu0 %v282_v45 }
 0x17a   : > { %1293 = vmatmul.mubr.f32.gmra.mrb[6].mxu1 %v273_v46 }
 0x17b   : > { %1745 = vmatmul.mubr.f32.gmra.mrb[6].mxu0 %v281_v47  ;;  %1298 = vmatprep.mubr.f32.mxu1 %v290_v48 }
 0x17c   : > { %1750 = vmatprep.mubr.f32.mxu0 %v298_v49 }
 0x17e   : > { %1299 = vmatmul.mubr.f32.gmra.mrb[8].mxu1 %v289_v50 }
 0x17f   : > { %1751 = vmatmul.mubr.f32.gmra.mrb[8].mxu0 %v297_v51  ;;  %1304 = vmatprep.mubr.f32.mxu1 %v306_v52 }
 0x180   : > { %1756 = vmatprep.mubr.f32.mxu0 %v314_v53 }
 0x182   : > { %1305 = vmatmul.mubr.f32.gmra.mrb[10].mxu1 %v305_v54 }
 0x183   : > { %1757 = vmatmul.mubr.f32.gmra.mrb[10].mxu0 %v313_v55  ;;  %1310 = vmatprep.mubr.f32.mxu1 %v322_v56 }
 0x184   : > { %1762 = vmatprep.mubr.f32.mxu0 %v330_v57 }
 0x186   : > { %1311 = vmatmul.mubr.f32.gmra.mrb[12].mxu1 %v321_v58 }
 0x187   : > { %1763 = vmatmul.mubr.f32.gmra.mrb[12].mxu0 %v329_v59  ;;  %1316 = vmatprep.mubr.f32.mxu1 %v338_v60 }
 0x188   : > { %1768 = vmatprep.mubr.f32.mxu0 %v346_v61 }
 0x18a   : > { %1317 = vmatmul.mubr.f32.gmra.mrb[14].mxu1 %v337_v62 }
 0x18b   : > { %1769 = vmatmul.mubr.f32.gmra.mrb[14].mxu0 %v345_v63 }
 0x241   : > { %v1276_v7 = vpop.f32.mrb[0].mxu1 }
 0x242   : > { %v2434_v8 = vadd.f32 %v1276_v7, %v3137_v5  ;;  %v1728_v9 = vpop.f32.mrb[0].mxu0  ;;  %v1278_v10 = vpop.f32.mrb[1].mxu1 }
 0x243   : > { %v2436_v11 = vadd.f32 %v1278_v10, %v3139_v6  ;;  %v1730_v12 = vpop.f32.mrb[1].mxu0 }
 0x244   : > { %v2435_v13 = vadd.f32 %v2434_v8, %v1728_v9 }
 0x245   : > { %v2437_v14 = vadd.f32 %v2436_v11, %v1730_v12  ;;  %v1282_v15 = vpop.f32.mrb[2].mxu1 }
 0x246   : > { %1775 = vst [vmem:[%s3144_s20] sm:$0xff] %v2435_v13  ;;  %v2438_v16 = vadd.f32 %v1282_v15, %v3137_v5  ;;  %v1734_v17 = vpop.f32.mrb[2].mxu0  ;;  %v1284_v18 = vpop.f32.mrb[3].mxu1 }
 0x247   : > { %1776 = vst [vmem:[%s3144_s20 + $0x8] sm:$0xff] %v2437_v14  ;;  %v2440_v19 = vadd.f32 %v1284_v18, %v3139_v6  ;;  %v1736_v20 = vpop.f32.mrb[3].mxu0 }
 0x248   : > { %v2439_v21 = vadd.f32 %v2438_v16, %v1734_v17 }
 0x249   : > { %v2441_v22 = vadd.f32 %v2440_v19, %v1736_v20  ;;  %v1288_v23 = vpop.f32.mrb[4].mxu1 }
 0x24a   : > { %1777 = vst [vmem:[%s3144_s20 + $0x10] sm:$0xff] %v2439_v21  ;;  %v2442_v24 = vadd.f32 %v1288_v23, %v3137_v5  ;;  %v1740_v25 = vpop.f32.mrb[4].mxu0  ;;  %v1290_v26 = vpop.f32.mrb[5].mxu1 }
 0x24b   : > { %1778 = vst [vmem:[%s3144_s20 + $0x18] sm:$0xff] %v2441_v22  ;;  %v2444_v27 = vadd.f32 %v1290_v26, %v3139_v6  ;;  %v1742_v28 = vpop.f32.mrb[5].mxu0 }
 0x24c   : > { %v2443_v29 = vadd.f32 %v2442_v24, %v1740_v25 }
 0x24d   : > { %v2445_v30 = vadd.f32 %v2444_v27, %v1742_v28  ;;  %v1294_v31 = vpop.f32.mrb[6].mxu1 }
 0x24e   : > { %1779 = vst [vmem:[%s3144_s20 + $0x20] sm:$0xff] %v2443_v29  ;;  %v2446_v32 = vadd.f32 %v1294_v31, %v3137_v5  ;;  %v1746_v33 = vpop.f32.mrb[6].mxu0  ;;  %v1296_v34 = vpop.f32.mrb[7].mxu1 }
 0x24f   : > { %1780 = vst [vmem:[%s3144_s20 + $0x28] sm:$0xff] %v2445_v30  ;;  %v2448_v35 = vadd.f32 %v1296_v34, %v3139_v6  ;;  %v1748_v36 = vpop.f32.mrb[7].mxu0 }
 0x250   : > { %v2447_v37 = vadd.f32 %v2446_v32, %v1746_v33 }
 0x251   : > { %v2449_v38 = vadd.f32 %v2448_v35, %v1748_v36  ;;  %v1300_v39 = vpop.f32.mrb[8].mxu1 }
 0x252   : > { %1781 = vst [vmem:[%s3144_s20 + $0x30] sm:$0xff] %v2447_v37  ;;  %v2450_v40 = vadd.f32 %v1300_v39, %v3137_v5  ;;  %v1752_v41 = vpop.f32.mrb[8].mxu0  ;;  %v1302_v42 = vpop.f32.mrb[9].mxu1 }
 0x253   : > { %1782 = vst [vmem:[%s3144_s20 + $0x38] sm:$0xff] %v2449_v38  ;;  %v2452_v43 = vadd.f32 %v1302_v42, %v3139_v6  ;;  %v1754_v44 = vpop.f32.mrb[9].mxu0 }
 0x254   : > { %v2451_v45 = vadd.f32 %v2450_v40, %v1752_v41 }
 0x255   : > { %v2453_v46 = vadd.f32 %v2452_v43, %v1754_v44  ;;  %v1306_v47 = vpop.f32.mrb[10].mxu1 }
 0x256   : > { %1783 = vst [vmem:[%s3144_s20 + $0x40] sm:$0xff] %v2451_v45  ;;  %v2454_v48 = vadd.f32 %v1306_v47, %v3137_v5  ;;  %v1758_v49 = vpop.f32.mrb[10].mxu0  ;;  %v1308_v50 = vpop.f32.mrb[11].mxu1 }
 0x257   : > { %1784 = vst [vmem:[%s3144_s20 + $0x48] sm:$0xff] %v2453_v46  ;;  %v2456_v51 = vadd.f32 %v1308_v50, %v3139_v6  ;;  %v1760_v52 = vpop.f32.mrb[11].mxu0 }
 0x258   : > { %v2455_v53 = vadd.f32 %v2454_v48, %v1758_v49 }
 0x259   : > { %v2457_v54 = vadd.f32 %v2456_v51, %v1760_v52  ;;  %v1312_v55 = vpop.f32.mrb[12].mxu1 }
 0x25a   : > { %1785 = vst [vmem:[%s3144_s20 + $0x50] sm:$0xff] %v2455_v53  ;;  %v2458_v56 = vadd.f32 %v1312_v55, %v3137_v5  ;;  %v1764_v57 = vpop.f32.mrb[12].mxu0  ;;  %v1314_v58 = vpop.f32.mrb[13].mxu1 }
 0x25b   : > { %1786 = vst [vmem:[%s3144_s20 + $0x58] sm:$0xff] %v2457_v54  ;;  %v2460_v59 = vadd.f32 %v1314_v58, %v3139_v6  ;;  %v1766_v60 = vpop.f32.mrb[13].mxu0 }
 0x25c   : > { %v2459_v61 = vadd.f32 %v2458_v56, %v1764_v57 }
 0x25d   : > { %v2461_v62 = vadd.f32 %v2460_v59, %v1766_v60  ;;  %v1318_v63 = vpop.f32.mrb[14].mxu1 }
 0x25e   : > { %1787 = vst [vmem:[%s3144_s20 + $0x60] sm:$0xff] %v2459_v61  ;;  %v2462_v0 = vadd.f32 %v1318_v63, %v3137_v5  ;;  %v1770_v1 = vpop.f32.mrb[14].mxu0  ;;  %v1320_v2 = vpop.f32.mrb[15].mxu1 }
 0x25f   : > { %1788 = vst [vmem:[%s3144_s20 + $0x68] sm:$0xff] %v2461_v62  ;;  %v2464_v3 = vadd.f32 %v1320_v2, %v3139_v6  ;;  %v1772_v4 = vpop.f32.mrb[15].mxu0 }
 0x260   : > { %v2463_v7 = vadd.f32 %v2462_v0, %v1770_v1 }
 0x261   : > { %v2465_v8 = vadd.f32 %v2464_v3, %v1772_v4 }
 0x262   : > { %1789 = vst [vmem:[%s3144_s20 + $0x70] sm:$0xff] %v2463_v7 }
 0x263   : > { %1790 = vst [vmem:[%s3144_s20 + $0x78] sm:$0xff] %v2465_v8 }
 0x264   : > { %2734 = shalt.err (!%p2731_p2)
}
 0x265   : > { %s2735_s10 = scalar_lea.hbm %s3179_s23, 2048  ;;  %s2739_s22 = scalar_lea.hbm %s3230_s3, 4096 }
 0x266   : > { %p2736_p13 = scmp.ne.s32.totalorder %s3179_s23, %s2735_s10  ;;  %p2740_p4 = scmp.lt.u32.totalorder %s3179_s23, %s3230_s3 }
 0x267   : > { %p2741_p5 = scmp.lt.u32.totalorder %s2739_s22, %s2735_s10  ;;  %p2743_p11 = scmp.lt.u32.totalorder %s2735_s10, %s3179_s23 }
 0x268   : > { %p2737_p6 = pnand %p2736_p13, %p3244_p0 }
 0x269   : > { %p2742_p8 = por %p2741_p5, %p2740_p4 }
 0x26a   : > { %p2738_p10 = pneg %p2737_p6 }
 0x26b   : > { %p2744_p1 = por %p2743_p11, %p2742_p8 }
 0x26d   : > { %p2745_p3 = pnand %p2744_p1, %p2738_p10 }
 0x26f   : > { %2748 = shalt.err (!%p2745_p3)
}
 0x270   : > { %s2801_s18 = smov 256   ;;  %s2802_s20 = smov 16  }
 0x271   : > { %2572 = dma.vmem_to_hbm [thread:$0]  (%p3244_p0), %s3181_s24, 2048, %s3179_s23, %s1792_s16, %s2801_s18, %s2801_s18, %s2802_s20  }
 0x272 PF: > { %s1821_s17 = sand.u32 1, %s2779_s12   ;;  %p3245_p7 = scmp.ne.s32.totalorder %s3235_s19, 0 }
 0x273   : > { %p3246_p9 = scmp.ge.s32.totalorder %s2791_s15, 2  ;;  %s1822_s26 = scalar_lea.sflag [#allocation4], %s1821_s17 }
 0x275   : > { %p2586_p12 = pnand %p3246_p9, %p3245_p7 }
 0x277   : > { %2774 = dma.done.wait (!%p2586_p12), %s1822_s26, 2048  }
 0x278   : > { %2776 = vsyncadd (!%p2586_p12), %s1822_s26, 4294965248  ;;  %p17_p2 = scmp.ge.s32.totalorder %s2933_s4, 4   ;;  %s3247_s12 = smov %s2783_s13 }
 0x279   : > { %s3248_s13 = smov %s2787_s14  ;;  %s3249_s14 = smov %s2949_s7 }
 0x27a   : > { %s3250_s15 = smov %s2933_s4  ;;  %19 = sbr.rel (!%p17_p2) target bundleno = 6 (0x6), region = 85 }
 0x281   :  { %1827 = vsyncpa [#allocation3], 1 }
 0x282   :  { %1829 = vsyncpa [#allocation3 + $0x1], 1 }
 0x283   :  { %1830 = vsyncpa [#allocation6], 1 }
 0x284   :  { %1831 = vsyncpa [#allocation4], 1 }
 0x285   :  { %1833 = vsyncpa [#allocation4 + $0x1], 1 }

</bundles_post_ra>
